<compile_context>
chip_gen: v7x
topology: tpu7x:2x2x1
jax: 0.10.0
libtpu: 0.0.40
codegen_flags: <defaults>
</compile_context>

<pallas_src>
import functools

import jax
import jax.numpy as jnp
from jax import lax
from jax.experimental import pallas as pl
from jax.experimental.pallas import tpu as pltpu

NEG_BIG = -1e30


def _round_up(x, m):
    return (x + m - 1) // m * m


# ------------------------------ kernel bodies --------------------------------

def _gat_project_kernel(h_ref, w_ref, asrc_ref, adst_ref,
                        hp_ref, ssrc_ref, sdst_ref):
    """Row-tile projection for ALL heads of one GAT layer.

    h_ref   : (tm, Fin)      f32   node features (row tile)
    w_ref   : (Fin, H*Fout)  bf16  packed weights (head-concat layout)
    asrc_ref: (H*Fout, H)    f32   block-diagonal a_src
    adst_ref: (H, H*Fout)    f32   block-diagonal a_dst
    hp_ref  : (tm, H*Fout)   bf16  projected features (row tile)
    ssrc_ref: (tm, H)        f32   per-head source logit halves
    sdst_ref: (H, tm)        f32   per-head dest logit halves (transposed)
    """
    h = h_ref[...].astype(jnp.bfloat16)
    # One MXU matmul for all heads (bf16 operands, f32 accumulation).
    hp = jnp.dot(h, w_ref[...], preferred_element_type=jnp.float32)
    hp_bf16 = hp.astype(jnp.bfloat16)
    # Attention-logit halves for all heads via block-diagonal a-matrices.
    ssrc_ref[...] = jnp.dot(hp_bf16, asrc_ref[...].astype(jnp.bfloat16),
                            preferred_element_type=jnp.float32)
    sdst_ref[...] = lax.dot_general(
        adst_ref[...].astype(jnp.bfloat16), hp_bf16,
        dimension_numbers=(((1,), (1,)), ((), ())),
        preferred_element_type=jnp.float32)
    hp_ref[...] = hp_bf16


def _gat_attend_kernel(ssrc_ref, sdst_ref, bias_ref, hp_ref, out_ref,
                       *, heads, fout, act, final, neg_slope):
    """Row-tile attention + aggregation for ALL heads of one GAT layer.

    ssrc_ref: (tm, H)        f32   (row tile)
    sdst_ref: (H, N)         f32   (full, resident)
    bias_ref: (tm, N)        bf16  additive adjacency bias (0 / -1e30)
    hp_ref  : (N, H*Fout)    bf16  (full, resident)
    out_ref : (tm, H*Fout)   f32
    """
    bias = bias_ref[...].astype(jnp.float32)
    ssrc = ssrc_ref[...]
    sdst = sdst_ref[...]
    hp = hp_ref[...]
    ns = jnp.float32(neg_slope)

    for hd in range(heads):                       # static unroll, heads small
        e = ssrc[:, hd:hd + 1] + sdst[hd:hd + 1, :]              # (tm, N)
        e = jnp.where(e > 0, e, ns * e) + bias                   # LeakyReLU+mask
        m = jnp.max(e, axis=1, keepdims=True)
        p = jnp.exp(e - m)                                       # masked -> 0
        denom = jnp.maximum(jnp.sum(p, axis=1, keepdims=True),
                            jnp.float32(1e-30))                  # isolated-safe
        # Aggregate un-normalized; normalize AFTER the matmul (exact, per-row).
        agg = jnp.dot(p.astype(jnp.bfloat16),
                      hp[:, hd * fout:(hd + 1) * fout],
                      preferred_element_type=jnp.float32)
        agg = agg * pl.reciprocal(denom, approx=True)            # EUP slot
        if act == "elu":
            # TODO(synk): expm1 would be slightly more precise for tiny |x|.
            agg = jnp.where(agg > 0, agg,
                            jnp.exp(jnp.minimum(agg, 0.0)) - 1.0)
        elif act == "relu":
            agg = jnp.maximum(agg, 0.0)
        # Write the head's result straight into its lane slice (no concat).
        out_ref[:, hd * fout:(hd + 1) * fout] = agg

    if final:
        # Fused log_softmax epilogue over classes for this row tile.
        z = out_ref[...]
        z = z - jnp.max(z, axis=1, keepdims=True)
        out_ref[...] = z - jnp.log(jnp.sum(jnp.exp(z), axis=1, keepdims=True))


# ------------------------------ param packing --------------------------------

def _block_diag_cols(a):
    """a: (H, F) -> (H*F, H); head h's vector in rows h*F:(h+1)*F, column h."""
    h, f = a.shape
    eye = jnp.eye(h, dtype=a.dtype)
    return (a[:, :, None] * eye[:, None, :]).reshape(h * f, h)


def _block_diag_rows(a):
    """a: (H, F) -> (H, H*F); head h's vector in row h, cols h*F:(h+1)*F."""
    h, f = a.shape
    eye = jnp.eye(h, dtype=a.dtype)
    return (eye[:, :, None] * a[None, :, :]).reshape(h, h * f)


def _pack_layer(lp):
    w = lp["w"]                                    # (H, Fin, Fout)
    heads, fin, fout = w.shape
    w_packed = (jnp.transpose(w, (1, 0, 2))
                .reshape(fin, heads * fout)
                .astype(jnp.bfloat16))             # bf16 MXU operand
    asrc = _block_diag_cols(lp["a_src"].reshape(heads, fout))
    adst = _block_diag_rows(lp["a_dst"].reshape(heads, fout))
    return w_packed, asrc, adst


# -------------------------------- layer call ----------------------------------

def _gat_layer(h, bias, w_packed, asrc_bd, adst_bd, *, heads, fout, act,
               final, neg_slope, tm, compiler_params):
    n_pad, fin = h.shape
    width = heads * fout
    grid = (n_pad // tm,)

    hp, ssrc, sdst = pl.pallas_call(
        _gat_project_kernel,
        grid=grid,
        in_specs=[
            pl.BlockSpec((tm, fin), lambda i: (i, 0)),
            pl.BlockSpec((fin, width), lambda i: (0, 0)),
            pl.BlockSpec((width, heads), lambda i: (0, 0)),
            pl.BlockSpec((heads, width), lambda i: (0, 0)),
        ],
        out_specs=(
            pl.BlockSpec((tm, width), lambda i: (i, 0)),
            pl.BlockSpec((tm, heads), lambda i: (i, 0)),
            pl.BlockSpec((heads, tm), lambda i: (0, i)),
        ),
        out_shape=(
            jax.ShapeDtypeStruct((n_pad, width), jnp.bfloat16),
            jax.ShapeDtypeStruct((n_pad, heads), jnp.float32),
            jax.ShapeDtypeStruct((heads, n_pad), jnp.float32),
        ),
        compiler_params=compiler_params,
    )(h, w_packed, asrc_bd, adst_bd)

    kernel = functools.partial(_gat_attend_kernel, heads=heads, fout=fout,
                               act=act, final=final, neg_slope=neg_slope)
    out = pl.pallas_call(
        kernel,
        grid=grid,
        in_specs=[
            pl.BlockSpec((tm, heads), lambda i: (i, 0)),
            pl.BlockSpec((heads, n_pad), lambda i: (0, 0)),   # resident
            pl.BlockSpec((tm, n_pad), lambda i: (i, 0)),      # streamed rows
            pl.BlockSpec((n_pad, width), lambda i: (0, 0)),   # resident
        ],
        out_specs=pl.BlockSpec((tm, width), lambda i: (i, 0)),
        out_shape=jax.ShapeDtypeStruct((n_pad, width), jnp.float32),
        compiler_params=compiler_params,
    )(ssrc, sdst, bias, hp)
    return out


# --------------------------------- wrappers -----------------------------------

def init_gat_params(key, in_feats, out_feats, heads):
    k1, k2, k3 = jax.random.split(key, 3)
    scale = 1.0 / jnp.sqrt(jnp.float32(in_feats))
    return {
        "w": jax.random.normal(k1, (heads, in_feats, out_feats),
                               jnp.float32) * scale,
        "a_src": jax.random.normal(k2, (heads, 1, out_feats),
                                   jnp.float32) * 0.1,
        "a_dst": jax.random.normal(k3, (heads, 1, out_feats),
                                   jnp.float32) * 0.1,
    }


def init_net_params(key, in_feats, hidden_feats, out_feats, heads, num_layers):
    keys = jax.random.split(key, num_layers)
    params = {"conv1": init_gat_params(keys[0], in_feats, hidden_feats, heads),
              "hidden": []}
    for i in range(num_layers - 2):
        params["hidden"].append(
            init_gat_params(keys[1 + i], hidden_feats * heads,
                            hidden_feats, heads))
    params["conv2"] = init_gat_params(keys[-1], hidden_feats * heads,
                                      out_feats, 1)
    return params


@functools.partial(jax.jit, static_argnames=("neg_slope",))
def net_forward(params, x, adj, neg_slope):
    layer_params = ([params["conv1"]] + list(params["hidden"])
                    + [params["conv2"]])
    acts = ["elu"] + ["relu"] * len(params["hidden"]) + ["none"]

    n = x.shape[0]
    # Row-tile size: MXU-friendly 128 at realistic N, full graph when tiny.
    tm = 128 if n >= 128 else _round_up(n, 8)
    n_pad = _round_up(n, tm)

    # Pad nodes; padded SOURCE columns are masked out via the additive bias so
    # they never contribute to real rows (self-loops keep real rows non-empty).
    x_p = jnp.zeros((n_pad, x.shape[1]), jnp.float32).at[:n, :].set(x)
    adj_p = jnp.zeros((n_pad, n_pad), adj.dtype).at[:n, :n].set(adj)
    bias = jnp.where(adj_p > 0, 0.0, NEG_BIG).astype(jnp.bfloat16)

    cp = pltpu.CompilerParams(dimension_semantics=("parallel",),
                              vmem_limit_bytes=48 * 1024 * 1024)

    h = x_p
    nl = len(layer_params)
    for li, (lp, act) in enumerate(zip(layer_params, acts)):
        heads, _, fout = lp["w"].shape
        w_packed, asrc_bd, adst_bd = _pack_layer(lp)
        h = _gat_layer(h, bias, w_packed, asrc_bd, adst_bd,
                       heads=heads, fout=fout, act=act,
                       final=(li == nl - 1), neg_slope=float(neg_slope),
                       tm=tm, compiler_params=cp)
        # TODO(synk): F.dropout(training=True) path not implemented (eval mode).

    return h[:n, :]


# ----------------------------------- main --------------------------------------

if __name__ == "__main__":
    key = jax.random.PRNGKey(0)
    k_x, k_adj, k_p = jax.random.split(key, 3)

    # small synthetic graph
    N = 16            # nodes
    in_feats = 16
    hidden_feats = 8
    out_feats = 8     # classes
    heads = 4
    num_layers = 3    # conv1 + 1 hidden + conv2
    alpha = 0.2       # LeakyReLU negative slope

    x = jax.random.normal(k_x, (N, in_feats), jnp.float32)

    # random symmetric adjacency with self-loops (dense stand-in for CSR)
    a = (jax.random.uniform(k_adj, (N, N)) < 0.3).astype(jnp.float32)
    adj = jnp.clip(a + a.T + jnp.eye(N, dtype=jnp.float32), 0.0, 1.0)

    params = init_net_params(k_p, in_feats, hidden_feats, out_feats,
                             heads, num_layers)

    out = jax.block_until_ready(net_forward(params, x, adj, alpha))

    assert out.shape == (N, out_feats)
    # rows of exp(log_softmax) must sum to ~1
    row_sums = jnp.sum(jnp.exp(out), axis=1)
    assert bool(jnp.all(jnp.abs(row_sums - 1.0) < 2e-3))
    print("KERNEL_OK")
</pallas_src>

<mosaic_0001>
module attributes {stable_mosaic.version = 11 : i64} {
  func.func @_gat_attend_kernel(%arg0: i32, %arg1: memref<16x4xf32, #tpu.memory_space<vmem>>, %arg2: memref<4x16xf32, #tpu.memory_space<vmem>>, %arg3: memref<16x16xbf16, #tpu.memory_space<vmem>>, %arg4: memref<16x32xbf16, #tpu.memory_space<vmem>>, %arg5: memref<16x32xf32, #tpu.memory_space<vmem>>) attributes {dimension_semantics = [#tpu.dimension_semantics<parallel>], iteration_bounds = array<i64: 1>, scalar_prefetch = 0 : i64, scratch_operands = 0 : i64, tpu.core_type = #tpu.core_type<tc>, window_params = [{transform_indices = @transform_0, window_bounds = array<i64: 16, 4>}, {pipeline_mode = #tpu.pipeline_mode<synchronous>, transform_indices = @transform_1, window_bounds = array<i64: 4, 16>}, {transform_indices = @transform_2, window_bounds = array<i64: 16, 16>}, {pipeline_mode = #tpu.pipeline_mode<synchronous>, transform_indices = @transform_3, window_bounds = array<i64: 16, 32>}, {transform_indices = @transform_4, window_bounds = array<i64: 16, 32>}]} {
    %c0 = arith.constant 0 : index
    %c0_0 = arith.constant 0 : index
    %0 = vector.load %arg3[%c0, %c0_0] : memref<16x16xbf16, #tpu.memory_space<vmem>>, vector<16x16xbf16>
    %1 = arith.extf %0 : vector<16x16xbf16> to vector<16x16xf32>
    %c0_1 = arith.constant 0 : index
    %c0_2 = arith.constant 0 : index
    %2 = vector.load %arg1[%c0_1, %c0_2] : memref<16x4xf32, #tpu.memory_space<vmem>>, vector<16x4xf32>
    %c0_3 = arith.constant 0 : index
    %c0_4 = arith.constant 0 : index
    %3 = vector.load %arg2[%c0_3, %c0_4] : memref<4x16xf32, #tpu.memory_space<vmem>>, vector<4x16xf32>
    %c0_5 = arith.constant 0 : index
    %c0_6 = arith.constant 0 : index
    %4 = vector.load %arg4[%c0_5, %c0_6] : memref<16x32xbf16, #tpu.memory_space<vmem>>, vector<16x32xbf16>
    %5 = vector.extract_strided_slice %2 {offsets = [0, 0], sizes = [16, 1], strides = [1, 1]} : vector<16x4xf32> to vector<16x1xf32>
    %6 = vector.extract_strided_slice %3 {offsets = [0, 0], sizes = [1, 16], strides = [1, 1]} : vector<4x16xf32> to vector<1x16xf32>
    %7 = vector.broadcast %5 : vector<16x1xf32> to vector<16x16xf32>
    %8 = vector.broadcast %6 : vector<1x16xf32> to vector<16x16xf32>
    %9 = arith.addf %7, %8 : vector<16x16xf32>
    %cst = arith.constant 0.000000e+00 : f32
    %10 = vector.broadcast %cst : f32 to vector<16x16xf32>
    %11 = arith.cmpf ogt, %9, %10 : vector<16x16xf32>
    %cst_7 = arith.constant 2.000000e-01 : f32
    %12 = vector.broadcast %cst_7 : f32 to vector<16x16xf32>
    %13 = arith.mulf %12, %9 : vector<16x16xf32>
    %14 = arith.select %11, %9, %13 : vector<16x16xi1>, vector<16x16xf32>
    %15 = arith.addf %14, %1 : vector<16x16xf32>
    %cst_8 = arith.constant dense<0xFF800000> : vector<16xf32>
    %16 = vector.multi_reduction <maximumf>, %15, %cst_8 [1] : vector<16x16xf32> to vector<16xf32>
    %17 = vector.shape_cast %16 : vector<16xf32> to vector<16x1xf32>
    %18 = vector.broadcast %17 : vector<16x1xf32> to vector<16x16xf32>
    %19 = arith.subf %15, %18 : vector<16x16xf32>
    %20 = math.exp %19 : vector<16x16xf32>
    %cst_9 = arith.constant dense<0.000000e+00> : vector<16xf32>
    %21 = vector.multi_reduction <add>, %20, %cst_9 [1] : vector<16x16xf32> to vector<16xf32>
    %22 = vector.shape_cast %21 : vector<16xf32> to vector<16x1xf32>
    %cst_10 = arith.constant 1.000000e-30 : f32
    %23 = vector.broadcast %cst_10 : f32 to vector<16x1xf32>
    %24 = arith.maximumf %22, %23 : vector<16x1xf32>
    %25 = arith.truncf %20 : vector<16x16xf32> to vector<16x16xbf16>
    %26 = vector.extract_strided_slice %4 {offsets = [0, 0], sizes = [16, 8], strides = [1, 1]} : vector<16x32xbf16> to vector<16x8xbf16>
    %cst_11 = arith.constant dense<0.000000e+00> : vector<16x8xf32>
    %27 = tpu.matmul %25, %26, %cst_11 {dimension_numbers = #tpu.dot_dimension_numbers<[1], [0], [0], [1], [0, 0, 1, 1], [], []>} : vector<16x16xbf16>, vector<16x8xbf16>, vector<16x8xf32> -> vector<16x8xf32>
    %28 = tpu.reciprocal %24 {approx = true} : vector<16x1xf32> -> vector<16x1xf32>
    %29 = vector.broadcast %28 : vector<16x1xf32> to vector<16x8xf32>
    %30 = arith.mulf %27, %29 : vector<16x8xf32>
    %cst_12 = arith.constant 0.000000e+00 : f32
    %31 = vector.broadcast %cst_12 : f32 to vector<16x8xf32>
    %32 = arith.cmpf ogt, %30, %31 : vector<16x8xf32>
    %cst_13 = arith.constant 0.000000e+00 : f32
    %33 = vector.broadcast %cst_13 : f32 to vector<16x8xf32>
    %34 = arith.minimumf %30, %33 : vector<16x8xf32>
    %35 = math.exp %34 : vector<16x8xf32>
    %cst_14 = arith.constant 1.000000e+00 : f32
    %36 = vector.broadcast %cst_14 : f32 to vector<16x8xf32>
    %37 = arith.subf %35, %36 : vector<16x8xf32>
    %38 = arith.select %32, %30, %37 : vector<16x8xi1>, vector<16x8xf32>
    %c0_15 = arith.constant 0 : index
    %c0_16 = arith.constant 0 : index
    %39 = vector.load %arg5[%c0_15, %c0_16] : memref<16x32xf32, #tpu.memory_space<vmem>>, vector<16x8xf32>
    tpu.vector_store %arg5[%c0_15, %c0_16], %38 {strides = array<i32>} : memref<16x32xf32, #tpu.memory_space<vmem>>, vector<16x8xf32>,
    %40 = vector.extract_strided_slice %2 {offsets = [0, 1], sizes = [16, 1], strides = [1, 1]} : vector<16x4xf32> to vector<16x1xf32>
    %41 = vector.extract_strided_slice %3 {offsets = [1, 0], sizes = [1, 16], strides = [1, 1]} : vector<4x16xf32> to vector<1x16xf32>
    %42 = vector.broadcast %40 : vector<16x1xf32> to vector<16x16xf32>
    %43 = vector.broadcast %41 : vector<1x16xf32> to vector<16x16xf32>
    %44 = arith.addf %42, %43 : vector<16x16xf32>
    %cst_17 = arith.constant 0.000000e+00 : f32
    %45 = vector.broadcast %cst_17 : f32 to vector<16x16xf32>
    %46 = arith.cmpf ogt, %44, %45 : vector<16x16xf32>
    %cst_18 = arith.constant 2.000000e-01 : f32
    %47 = vector.broadcast %cst_18 : f32 to vector<16x16xf32>
    %48 = arith.mulf %47, %44 : vector<16x16xf32>
    %49 = arith.select %46, %44, %48 : vector<16x16xi1>, vector<16x16xf32>
    %50 = arith.addf %49, %1 : vector<16x16xf32>
    %cst_19 = arith.constant dense<0xFF800000> : vector<16xf32>
    %51 = vector.multi_reduction <maximumf>, %50, %cst_19 [1] : vector<16x16xf32> to vector<16xf32>
    %52 = vector.shape_cast %51 : vector<16xf32> to vector<16x1xf32>
    %53 = vector.broadcast %52 : vector<16x1xf32> to vector<16x16xf32>
    %54 = arith.subf %50, %53 : vector<16x16xf32>
    %55 = math.exp %54 : vector<16x16xf32>
    %cst_20 = arith.constant dense<0.000000e+00> : vector<16xf32>
    %56 = vector.multi_reduction <add>, %55, %cst_20 [1] : vector<16x16xf32> to vector<16xf32>
    %57 = vector.shape_cast %56 : vector<16xf32> to vector<16x1xf32>
    %cst_21 = arith.constant 1.000000e-30 : f32
    %58 = vector.broadcast %cst_21 : f32 to vector<16x1xf32>
    %59 = arith.maximumf %57, %58 : vector<16x1xf32>
    %60 = arith.truncf %55 : vector<16x16xf32> to vector<16x16xbf16>
    %61 = vector.extract_strided_slice %4 {offsets = [0, 8], sizes = [16, 8], strides = [1, 1]} : vector<16x32xbf16> to vector<16x8xbf16>
    %cst_22 = arith.constant dense<0.000000e+00> : vector<16x8xf32>
    %62 = tpu.matmul %60, %61, %cst_22 {dimension_numbers = #tpu.dot_dimension_numbers<[1], [0], [0], [1], [0, 0, 1, 1], [], []>} : vector<16x16xbf16>, vector<16x8xbf16>, vector<16x8xf32> -> vector<16x8xf32>
    %63 = tpu.reciprocal %59 {approx = true} : vector<16x1xf32> -> vector<16x1xf32>
    %64 = vector.broadcast %63 : vector<16x1xf32> to vector<16x8xf32>
    %65 = arith.mulf %62, %64 : vector<16x8xf32>
    %cst_23 = arith.constant 0.000000e+00 : f32
    %66 = vector.broadcast %cst_23 : f32 to vector<16x8xf32>
    %67 = arith.cmpf ogt, %65, %66 : vector<16x8xf32>
    %cst_24 = arith.constant 0.000000e+00 : f32
    %68 = vector.broadcast %cst_24 : f32 to vector<16x8xf32>
    %69 = arith.minimumf %65, %68 : vector<16x8xf32>
    %70 = math.exp %69 : vector<16x8xf32>
    %cst_25 = arith.constant 1.000000e+00 : f32
    %71 = vector.broadcast %cst_25 : f32 to vector<16x8xf32>
    %72 = arith.subf %70, %71 : vector<16x8xf32>
    %73 = arith.select %67, %65, %72 : vector<16x8xi1>, vector<16x8xf32>
    %c0_26 = arith.constant 0 : index
    %c8 = arith.constant 8 : index
    %74 = vector.load %arg5[%c0_26, %c8] : memref<16x32xf32, #tpu.memory_space<vmem>>, vector<16x8xf32>
    tpu.vector_store %arg5[%c0_26, %c8], %73 {strides = array<i32>} : memref<16x32xf32, #tpu.memory_space<vmem>>, vector<16x8xf32>,
    %75 = vector.extract_strided_slice %2 {offsets = [0, 2], sizes = [16, 1], strides = [1, 1]} : vector<16x4xf32> to vector<16x1xf32>
    %76 = vector.extract_strided_slice %3 {offsets = [2, 0], sizes = [1, 16], strides = [1, 1]} : vector<4x16xf32> to vector<1x16xf32>
    %77 = vector.broadcast %75 : vector<16x1xf32> to vector<16x16xf32>
    %78 = vector.broadcast %76 : vector<1x16xf32> to vector<16x16xf32>
    %79 = arith.addf %77, %78 : vector<16x16xf32>
    %cst_27 = arith.constant 0.000000e+00 : f32
    %80 = vector.broadcast %cst_27 : f32 to vector<16x16xf32>
    %81 = arith.cmpf ogt, %79, %80 : vector<16x16xf32>
    %cst_28 = arith.constant 2.000000e-01 : f32
    %82 = vector.broadcast %cst_28 : f32 to vector<16x16xf32>
    %83 = arith.mulf %82, %79 : vector<16x16xf32>
    %84 = arith.select %81, %79, %83 : vector<16x16xi1>, vector<16x16xf32>
    %85 = arith.addf %84, %1 : vector<16x16xf32>
    %cst_29 = arith.constant dense<0xFF800000> : vector<16xf32>
    %86 = vector.multi_reduction <maximumf>, %85, %cst_29 [1] : vector<16x16xf32> to vector<16xf32>
    %87 = vector.shape_cast %86 : vector<16xf32> to vector<16x1xf32>
    %88 = vector.broadcast %87 : vector<16x1xf32> to vector<16x16xf32>
    %89 = arith.subf %85, %88 : vector<16x16xf32>
    %90 = math.exp %89 : vector<16x16xf32>
    %cst_30 = arith.constant dense<0.000000e+00> : vector<16xf32>
    %91 = vector.multi_reduction <add>, %90, %cst_30 [1] : vector<16x16xf32> to vector<16xf32>
    %92 = vector.shape_cast %91 : vector<16xf32> to vector<16x1xf32>
    %cst_31 = arith.constant 1.000000e-30 : f32
    %93 = vector.broadcast %cst_31 : f32 to vector<16x1xf32>
    %94 = arith.maximumf %92, %93 : vector<16x1xf32>
    %95 = arith.truncf %90 : vector<16x16xf32> to vector<16x16xbf16>
    %96 = vector.extract_strided_slice %4 {offsets = [0, 16], sizes = [16, 8], strides = [1, 1]} : vector<16x32xbf16> to vector<16x8xbf16>
    %cst_32 = arith.constant dense<0.000000e+00> : vector<16x8xf32>
    %97 = tpu.matmul %95, %96, %cst_32 {dimension_numbers = #tpu.dot_dimension_numbers<[1], [0], [0], [1], [0, 0, 1, 1], [], []>} : vector<16x16xbf16>, vector<16x8xbf16>, vector<16x8xf32> -> vector<16x8xf32>
    %98 = tpu.reciprocal %94 {approx = true} : vector<16x1xf32> -> vector<16x1xf32>
    %99 = vector.broadcast %98 : vector<16x1xf32> to vector<16x8xf32>
    %100 = arith.mulf %97, %99 : vector<16x8xf32>
    %cst_33 = arith.constant 0.000000e+00 : f32
    %101 = vector.broadcast %cst_33 : f32 to vector<16x8xf32>
    %102 = arith.cmpf ogt, %100, %101 : vector<16x8xf32>
    %cst_34 = arith.constant 0.000000e+00 : f32
    %103 = vector.broadcast %cst_34 : f32 to vector<16x8xf32>
    %104 = arith.minimumf %100, %103 : vector<16x8xf32>
    %105 = math.exp %104 : vector<16x8xf32>
    %cst_35 = arith.constant 1.000000e+00 : f32
    %106 = vector.broadcast %cst_35 : f32 to vector<16x8xf32>
    %107 = arith.subf %105, %106 : vector<16x8xf32>
    %108 = arith.select %102, %100, %107 : vector<16x8xi1>, vector<16x8xf32>
    %c0_36 = arith.constant 0 : index
    %c16 = arith.constant 16 : index
    %109 = vector.load %arg5[%c0_36, %c16] : memref<16x32xf32, #tpu.memory_space<vmem>>, vector<16x8xf32>
    tpu.vector_store %arg5[%c0_36, %c16], %108 {strides = array<i32>} : memref<16x32xf32, #tpu.memory_space<vmem>>, vector<16x8xf32>,
    %110 = vector.extract_strided_slice %2 {offsets = [0, 3], sizes = [16, 1], strides = [1, 1]} : vector<16x4xf32> to vector<16x1xf32>
    %111 = vector.extract_strided_slice %3 {offsets = [3, 0], sizes = [1, 16], strides = [1, 1]} : vector<4x16xf32> to vector<1x16xf32>
    %112 = vector.broadcast %110 : vector<16x1xf32> to vector<16x16xf32>
    %113 = vector.broadcast %111 : vector<1x16xf32> to vector<16x16xf32>
    %114 = arith.addf %112, %113 : vector<16x16xf32>
    %cst_37 = arith.constant 0.000000e+00 : f32
    %115 = vector.broadcast %cst_37 : f32 to vector<16x16xf32>
    %116 = arith.cmpf ogt, %114, %115 : vector<16x16xf32>
    %cst_38 = arith.constant 2.000000e-01 : f32
    %117 = vector.broadcast %cst_38 : f32 to vector<16x16xf32>
    %118 = arith.mulf %117, %114 : vector<16x16xf32>
    %119 = arith.select %116, %114, %118 : vector<16x16xi1>, vector<16x16xf32>
    %120 = arith.addf %119, %1 : vector<16x16xf32>
    %cst_39 = arith.constant dense<0xFF800000> : vector<16xf32>
    %121 = vector.multi_reduction <maximumf>, %120, %cst_39 [1] : vector<16x16xf32> to vector<16xf32>
    %122 = vector.shape_cast %121 : vector<16xf32> to vector<16x1xf32>
    %123 = vector.broadcast %122 : vector<16x1xf32> to vector<16x16xf32>
    %124 = arith.subf %120, %123 : vector<16x16xf32>
    %125 = math.exp %124 : vector<16x16xf32>
    %cst_40 = arith.constant dense<0.000000e+00> : vector<16xf32>
    %126 = vector.multi_reduction <add>, %125, %cst_40 [1] : vector<16x16xf32> to vector<16xf32>
    %127 = vector.shape_cast %126 : vector<16xf32> to vector<16x1xf32>
    %cst_41 = arith.constant 1.000000e-30 : f32
    %128 = vector.broadcast %cst_41 : f32 to vector<16x1xf32>
    %129 = arith.maximumf %127, %128 : vector<16x1xf32>
    %130 = arith.truncf %125 : vector<16x16xf32> to vector<16x16xbf16>
    %131 = vector.extract_strided_slice %4 {offsets = [0, 24], sizes = [16, 8], strides = [1, 1]} : vector<16x32xbf16> to vector<16x8xbf16>
    %cst_42 = arith.constant dense<0.000000e+00> : vector<16x8xf32>
    %132 = tpu.matmul %130, %131, %cst_42 {dimension_numbers = #tpu.dot_dimension_numbers<[1], [0], [0], [1], [0, 0, 1, 1], [], []>} : vector<16x16xbf16>, vector<16x8xbf16>, vector<16x8xf32> -> vector<16x8xf32>
    %133 = tpu.reciprocal %129 {approx = true} : vector<16x1xf32> -> vector<16x1xf32>
    %134 = vector.broadcast %133 : vector<16x1xf32> to vector<16x8xf32>
    %135 = arith.mulf %132, %134 : vector<16x8xf32>
    %cst_43 = arith.constant 0.000000e+00 : f32
    %136 = vector.broadcast %cst_43 : f32 to vector<16x8xf32>
    %137 = arith.cmpf ogt, %135, %136 : vector<16x8xf32>
    %cst_44 = arith.constant 0.000000e+00 : f32
    %138 = vector.broadcast %cst_44 : f32 to vector<16x8xf32>
    %139 = arith.minimumf %135, %138 : vector<16x8xf32>
    %140 = math.exp %139 : vector<16x8xf32>
    %cst_45 = arith.constant 1.000000e+00 : f32
    %141 = vector.broadcast %cst_45 : f32 to vector<16x8xf32>
    %142 = arith.subf %140, %141 : vector<16x8xf32>
    %143 = arith.select %137, %135, %142 : vector<16x8xi1>, vector<16x8xf32>
    %c0_46 = arith.constant 0 : index
    %c24 = arith.constant 24 : index
    %144 = vector.load %arg5[%c0_46, %c24] : memref<16x32xf32, #tpu.memory_space<vmem>>, vector<16x8xf32>
    tpu.vector_store %arg5[%c0_46, %c24], %143 {strides = array<i32>} : memref<16x32xf32, #tpu.memory_space<vmem>>, vector<16x8xf32>,
    return
  }
  func.func @transform_0(%arg0: i32) -> (i32, i32) {
    %c0_i32 = arith.constant 0 : i32
    %c0_i32_0 = arith.constant 0 : i32
    return %arg0, %c0_i32 : i32, i32
  }
  func.func @transform_1(%arg0: i32) -> (i32, i32) {
    %c0_i32 = arith.constant 0 : i32
    %c0_i32_0 = arith.constant 0 : i32
    %c0_i32_1 = arith.constant 0 : i32
    return %c0_i32, %c0_i32_0 : i32, i32
  }
  func.func @transform_2(%arg0: i32) -> (i32, i32) {
    %c0_i32 = arith.constant 0 : i32
    %c0_i32_0 = arith.constant 0 : i32
    return %arg0, %c0_i32 : i32, i32
  }
  func.func @transform_3(%arg0: i32) -> (i32, i32) {
    %c0_i32 = arith.constant 0 : i32
    %c0_i32_0 = arith.constant 0 : i32
    %c0_i32_1 = arith.constant 0 : i32
    return %c0_i32, %c0_i32_0 : i32, i32
  }
  func.func @transform_4(%arg0: i32) -> (i32, i32) {
    %c0_i32 = arith.constant 0 : i32
    %c0_i32_0 = arith.constant 0 : i32
    return %arg0, %c0_i32 : i32, i32
  }
}

module attributes {stable_mosaic.version = 11 : i64} {
  func.func @_gat_project_kernel(%arg0: i32, %arg1: memref<16x16xf32, #tpu.memory_space<vmem>>, %arg2: memref<16x32xbf16, #tpu.memory_space<vmem>>, %arg3: memref<32x4xf32, #tpu.memory_space<vmem>>, %arg4: memref<4x32xf32, #tpu.memory_space<vmem>>, %arg5: memref<16x32xbf16, #tpu.memory_space<vmem>>, %arg6: memref<16x4xf32, #tpu.memory_space<vmem>>, %arg7: memref<4x16xf32, #tpu.memory_space<vmem>>) attributes {dimension_semantics = [#tpu.dimension_semantics<parallel>], iteration_bounds = array<i64: 1>, scalar_prefetch = 0 : i64, scratch_operands = 0 : i64, tpu.core_type = #tpu.core_type<tc>, window_params = [{transform_indices = @transform_0, window_bounds = array<i64: 16, 16>}, {pipeline_mode = #tpu.pipeline_mode<synchronous>, transform_indices = @transform_1, window_bounds = array<i64: 16, 32>}, {pipeline_mode = #tpu.pipeline_mode<synchronous>, transform_indices = @transform_2, window_bounds = array<i64: 32, 4>}, {pipeline_mode = #tpu.pipeline_mode<synchronous>, transform_indices = @transform_3, window_bounds = array<i64: 4, 32>}, {transform_indices = @transform_4, window_bounds = array<i64: 16, 32>}, {transform_indices = @transform_5, window_bounds = array<i64: 16, 4>}, {transform_indices = @transform_6, window_bounds = array<i64: 4, 16>}]} {
    %c0 = arith.constant 0 : index
    %c0_0 = arith.constant 0 : index
    %0 = vector.load %arg1[%c0, %c0_0] : memref<16x16xf32, #tpu.memory_space<vmem>>, vector<16x16xf32>
    %1 = arith.truncf %0 : vector<16x16xf32> to vector<16x16xbf16>
    %c0_1 = arith.constant 0 : index
    %c0_2 = arith.constant 0 : index
    %2 = vector.load %arg2[%c0_1, %c0_2] : memref<16x32xbf16, #tpu.memory_space<vmem>>, vector<16x32xbf16>
    %cst = arith.constant dense<0.000000e+00> : vector<16x32xf32>
    %3 = tpu.matmul %1, %2, %cst {dimension_numbers = #tpu.dot_dimension_numbers<[1], [0], [0], [1], [0, 0, 1, 1], [], []>} : vector<16x16xbf16>, vector<16x32xbf16>, vector<16x32xf32> -> vector<16x32xf32>
    %4 = arith.truncf %3 : vector<16x32xf32> to vector<16x32xbf16>
    %c0_3 = arith.constant 0 : index
    %c0_4 = arith.constant 0 : index
    %5 = vector.load %arg3[%c0_3, %c0_4] : memref<32x4xf32, #tpu.memory_space<vmem>>, vector<32x4xf32>
    %6 = arith.truncf %5 : vector<32x4xf32> to vector<32x4xbf16>
    %cst_5 = arith.constant dense<0.000000e+00> : vector<16x4xf32>
    %7 = tpu.matmul %4, %6, %cst_5 {dimension_numbers = #tpu.dot_dimension_numbers<[1], [0], [0], [1], [0, 0, 1, 1], [], []>} : vector<16x32xbf16>, vector<32x4xbf16>, vector<16x4xf32> -> vector<16x4xf32>
    %c0_6 = arith.constant 0 : index
    %c0_7 = arith.constant 0 : index
    %8 = vector.load %arg6[%c0_6, %c0_7] : memref<16x4xf32, #tpu.memory_space<vmem>>, vector<16x4xf32>
    tpu.vector_store %arg6[%c0_6, %c0_7], %7 {strides = array<i32>} : memref<16x4xf32, #tpu.memory_space<vmem>>, vector<16x4xf32>,
    %c0_8 = arith.constant 0 : index
    %c0_9 = arith.constant 0 : index
    %9 = vector.load %arg4[%c0_8, %c0_9] : memref<4x32xf32, #tpu.memory_space<vmem>>, vector<4x32xf32>
    %10 = arith.truncf %9 : vector<4x32xf32> to vector<4x32xbf16>
    %cst_10 = arith.constant dense<0.000000e+00> : vector<4x16xf32>
    %11 = tpu.matmul %10, %4, %cst_10 {dimension_numbers = #tpu.dot_dimension_numbers<[1], [1], [0], [0], [0, 0, 1, 0], [], []>} : vector<4x32xbf16>, vector<16x32xbf16>, vector<4x16xf32> -> vector<4x16xf32>
    %c0_11 = arith.constant 0 : index
    %c0_12 = arith.constant 0 : index
    %12 = vector.load %arg7[%c0_11, %c0_12] : memref<4x16xf32, #tpu.memory_space<vmem>>, vector<4x16xf32>
    tpu.vector_store %arg7[%c0_11, %c0_12], %11 {strides = array<i32>} : memref<4x16xf32, #tpu.memory_space<vmem>>, vector<4x16xf32>,
    %c0_13 = arith.constant 0 : index
    %c0_14 = arith.constant 0 : index
    %13 = vector.load %arg5[%c0_13, %c0_14] : memref<16x32xbf16, #tpu.memory_space<vmem>>, vector<16x32xbf16>
    tpu.vector_store %arg5[%c0_13, %c0_14], %4 {strides = array<i32>} : memref<16x32xbf16, #tpu.memory_space<vmem>>, vector<16x32xbf16>,
    return
  }
  func.func @transform_0(%arg0: i32) -> (i32, i32) {
    %c0_i32 = arith.constant 0 : i32
    %c0_i32_0 = arith.constant 0 : i32
    return %arg0, %c0_i32 : i32, i32
  }
  func.func @transform_1(%arg0: i32) -> (i32, i32) {
    %c0_i32 = arith.constant 0 : i32
    %c0_i32_0 = arith.constant 0 : i32
    %c0_i32_1 = arith.constant 0 : i32
    return %c0_i32, %c0_i32_0 : i32, i32
  }
  func.func @transform_2(%arg0: i32) -> (i32, i32) {
    %c0_i32 = arith.constant 0 : i32
    %c0_i32_0 = arith.constant 0 : i32
    %c0_i32_1 = arith.constant 0 : i32
    return %c0_i32, %c0_i32_0 : i32, i32
  }
  func.func @transform_3(%arg0: i32) -> (i32, i32) {
    %c0_i32 = arith.constant 0 : i32
    %c0_i32_0 = arith.constant 0 : i32
    %c0_i32_1 = arith.constant 0 : i32
    return %c0_i32, %c0_i32_0 : i32, i32
  }
  func.func @transform_4(%arg0: i32) -> (i32, i32) {
    %c0_i32 = arith.constant 0 : i32
    %c0_i32_0 = arith.constant 0 : i32
    return %arg0, %c0_i32 : i32, i32
  }
  func.func @transform_5(%arg0: i32) -> (i32, i32) {
    %c0_i32 = arith.constant 0 : i32
    %c0_i32_0 = arith.constant 0 : i32
    return %arg0, %c0_i32 : i32, i32
  }
  func.func @transform_6(%arg0: i32) -> (i32, i32) {
    %c0_i32 = arith.constant 0 : i32
    %c0_i32_0 = arith.constant 0 : i32
    return %c0_i32, %arg0 : i32, i32
  }
}

module attributes {stable_mosaic.version = 11 : i64} {
  func.func @_gat_attend_kernel(%arg0: i32, %arg1: memref<16x4xf32, #tpu.memory_space<vmem>>, %arg2: memref<4x16xf32, #tpu.memory_space<vmem>>, %arg3: memref<16x16xbf16, #tpu.memory_space<vmem>>, %arg4: memref<16x32xbf16, #tpu.memory_space<vmem>>, %arg5: memref<16x32xf32, #tpu.memory_space<vmem>>) attributes {dimension_semantics = [#tpu.dimension_semantics<parallel>], iteration_bounds = array<i64: 1>, scalar_prefetch = 0 : i64, scratch_operands = 0 : i64, tpu.core_type = #tpu.core_type<tc>, window_params = [{transform_indices = @transform_0, window_bounds = array<i64: 16, 4>}, {pipeline_mode = #tpu.pipeline_mode<synchronous>, transform_indices = @transform_1, window_bounds = array<i64: 4, 16>}, {transform_indices = @transform_2, window_bounds = array<i64: 16, 16>}, {pipeline_mode = #tpu.pipeline_mode<synchronous>, transform_indices = @transform_3, window_bounds = array<i64: 16, 32>}, {transform_indices = @transform_4, window_bounds = array<i64: 16, 32>}]} {
    %c0 = arith.constant 0 : index
    %c0_0 = arith.constant 0 : index
    %0 = vector.load %arg3[%c0, %c0_0] : memref<16x16xbf16, #tpu.memory_space<vmem>>, vector<16x16xbf16>
    %1 = arith.extf %0 : vector<16x16xbf16> to vector<16x16xf32>
    %c0_1 = arith.constant 0 : index
    %c0_2 = arith.constant 0 : index
    %2 = vector.load %arg1[%c0_1, %c0_2] : memref<16x4xf32, #tpu.memory_space<vmem>>, vector<16x4xf32>
    %c0_3 = arith.constant 0 : index
    %c0_4 = arith.constant 0 : index
    %3 = vector.load %arg2[%c0_3, %c0_4] : memref<4x16xf32, #tpu.memory_space<vmem>>, vector<4x16xf32>
    %c0_5 = arith.constant 0 : index
    %c0_6 = arith.constant 0 : index
    %4 = vector.load %arg4[%c0_5, %c0_6] : memref<16x32xbf16, #tpu.memory_space<vmem>>, vector<16x32xbf16>
    %5 = vector.extract_strided_slice %2 {offsets = [0, 0], sizes = [16, 1], strides = [1, 1]} : vector<16x4xf32> to vector<16x1xf32>
    %6 = vector.extract_strided_slice %3 {offsets = [0, 0], sizes = [1, 16], strides = [1, 1]} : vector<4x16xf32> to vector<1x16xf32>
    %7 = vector.broadcast %5 : vector<16x1xf32> to vector<16x16xf32>
    %8 = vector.broadcast %6 : vector<1x16xf32> to vector<16x16xf32>
    %9 = arith.addf %7, %8 : vector<16x16xf32>
    %cst = arith.constant 0.000000e+00 : f32
    %10 = vector.broadcast %cst : f32 to vector<16x16xf32>
    %11 = arith.cmpf ogt, %9, %10 : vector<16x16xf32>
    %cst_7 = arith.constant 2.000000e-01 : f32
    %12 = vector.broadcast %cst_7 : f32 to vector<16x16xf32>
    %13 = arith.mulf %12, %9 : vector<16x16xf32>
    %14 = arith.select %11, %9, %13 : vector<16x16xi1>, vector<16x16xf32>
    %15 = arith.addf %14, %1 : vector<16x16xf32>
    %cst_8 = arith.constant dense<0xFF800000> : vector<16xf32>
    %16 = vector.multi_reduction <maximumf>, %15, %cst_8 [1] : vector<16x16xf32> to vector<16xf32>
    %17 = vector.shape_cast %16 : vector<16xf32> to vector<16x1xf32>
    %18 = vector.broadcast %17 : vector<16x1xf32> to vector<16x16xf32>
    %19 = arith.subf %15, %18 : vector<16x16xf32>
    %20 = math.exp %19 : vector<16x16xf32>
    %cst_9 = arith.constant dense<0.000000e+00> : vector<16xf32>
    %21 = vector.multi_reduction <add>, %20, %cst_9 [1] : vector<16x16xf32> to vector<16xf32>
    %22 = vector.shape_cast %21 : vector<16xf32> to vector<16x1xf32>
    %cst_10 = arith.constant 1.000000e-30 : f32
    %23 = vector.broadcast %cst_10 : f32 to vector<16x1xf32>
    %24 = arith.maximumf %22, %23 : vector<16x1xf32>
    %25 = arith.truncf %20 : vector<16x16xf32> to vector<16x16xbf16>
    %26 = vector.extract_strided_slice %4 {offsets = [0, 0], sizes = [16, 8], strides = [1, 1]} : vector<16x32xbf16> to vector<16x8xbf16>
    %cst_11 = arith.constant dense<0.000000e+00> : vector<16x8xf32>
    %27 = tpu.matmul %25, %26, %cst_11 {dimension_numbers = #tpu.dot_dimension_numbers<[1], [0], [0], [1], [0, 0, 1, 1], [], []>} : vector<16x16xbf16>, vector<16x8xbf16>, vector<16x8xf32> -> vector<16x8xf32>
    %28 = tpu.reciprocal %24 {approx = true} : vector<16x1xf32> -> vector<16x1xf32>
    %29 = vector.broadcast %28 : vector<16x1xf32> to vector<16x8xf32>
    %30 = arith.mulf %27, %29 : vector<16x8xf32>
    %cst_12 = arith.constant 0.000000e+00 : f32
    %31 = vector.broadcast %cst_12 : f32 to vector<16x8xf32>
    %32 = arith.maximumf %30, %31 : vector<16x8xf32>
    %c0_13 = arith.constant 0 : index
    %c0_14 = arith.constant 0 : index
    %33 = vector.load %arg5[%c0_13, %c0_14] : memref<16x32xf32, #tpu.memory_space<vmem>>, vector<16x8xf32>
    tpu.vector_store %arg5[%c0_13, %c0_14], %32 {strides = array<i32>} : memref<16x32xf32, #tpu.memory_space<vmem>>, vector<16x8xf32>,
    %34 = vector.extract_strided_slice %2 {offsets = [0, 1], sizes = [16, 1], strides = [1, 1]} : vector<16x4xf32> to vector<16x1xf32>
    %35 = vector.extract_strided_slice %3 {offsets = [1, 0], sizes = [1, 16], strides = [1, 1]} : vector<4x16xf32> to vector<1x16xf32>
    %36 = vector.broadcast %34 : vector<16x1xf32> to vector<16x16xf32>
    %37 = vector.broadcast %35 : vector<1x16xf32> to vector<16x16xf32>
    %38 = arith.addf %36, %37 : vector<16x16xf32>
    %cst_15 = arith.constant 0.000000e+00 : f32
    %39 = vector.broadcast %cst_15 : f32 to vector<16x16xf32>
    %40 = arith.cmpf ogt, %38, %39 : vector<16x16xf32>
    %cst_16 = arith.constant 2.000000e-01 : f32
    %41 = vector.broadcast %cst_16 : f32 to vector<16x16xf32>
    %42 = arith.mulf %41, %38 : vector<16x16xf32>
    %43 = arith.select %40, %38, %42 : vector<16x16xi1>, vector<16x16xf32>
    %44 = arith.addf %43, %1 : vector<16x16xf32>
    %cst_17 = arith.constant dense<0xFF800000> : vector<16xf32>
    %45 = vector.multi_reduction <maximumf>, %44, %cst_17 [1] : vector<16x16xf32> to vector<16xf32>
    %46 = vector.shape_cast %45 : vector<16xf32> to vector<16x1xf32>
    %47 = vector.broadcast %46 : vector<16x1xf32> to vector<16x16xf32>
    %48 = arith.subf %44, %47 : vector<16x16xf32>
    %49 = math.exp %48 : vector<16x16xf32>
    %cst_18 = arith.constant dense<0.000000e+00> : vector<16xf32>
    %50 = vector.multi_reduction <add>, %49, %cst_18 [1] : vector<16x16xf32> to vector<16xf32>
    %51 = vector.shape_cast %50 : vector<16xf32> to vector<16x1xf32>
    %cst_19 = arith.constant 1.000000e-30 : f32
    %52 = vector.broadcast %cst_19 : f32 to vector<16x1xf32>
    %53 = arith.maximumf %51, %52 : vector<16x1xf32>
    %54 = arith.truncf %49 : vector<16x16xf32> to vector<16x16xbf16>
    %55 = vector.extract_strided_slice %4 {offsets = [0, 8], sizes = [16, 8], strides = [1, 1]} : vector<16x32xbf16> to vector<16x8xbf16>
    %cst_20 = arith.constant dense<0.000000e+00> : vector<16x8xf32>
    %56 = tpu.matmul %54, %55, %cst_20 {dimension_numbers = #tpu.dot_dimension_numbers<[1], [0], [0], [1], [0, 0, 1, 1], [], []>} : vector<16x16xbf16>, vector<16x8xbf16>, vector<16x8xf32> -> vector<16x8xf32>
    %57 = tpu.reciprocal %53 {approx = true} : vector<16x1xf32> -> vector<16x1xf32>
    %58 = vector.broadcast %57 : vector<16x1xf32> to vector<16x8xf32>
    %59 = arith.mulf %56, %58 : vector<16x8xf32>
    %cst_21 = arith.constant 0.000000e+00 : f32
    %60 = vector.broadcast %cst_21 : f32 to vector<16x8xf32>
    %61 = arith.maximumf %59, %60 : vector<16x8xf32>
    %c0_22 = arith.constant 0 : index
    %c8 = arith.constant 8 : index
    %62 = vector.load %arg5[%c0_22, %c8] : memref<16x32xf32, #tpu.memory_space<vmem>>, vector<16x8xf32>
    tpu.vector_store %arg5[%c0_22, %c8], %61 {strides = array<i32>} : memref<16x32xf32, #tpu.memory_space<vmem>>, vector<16x8xf32>,
    %63 = vector.extract_strided_slice %2 {offsets = [0, 2], sizes = [16, 1], strides = [1, 1]} : vector<16x4xf32> to vector<16x1xf32>
    %64 = vector.extract_strided_slice %3 {offsets = [2, 0], sizes = [1, 16], strides = [1, 1]} : vector<4x16xf32> to vector<1x16xf32>
    %65 = vector.broadcast %63 : vector<16x1xf32> to vector<16x16xf32>
    %66 = vector.broadcast %64 : vector<1x16xf32> to vector<16x16xf32>
    %67 = arith.addf %65, %66 : vector<16x16xf32>
    %cst_23 = arith.constant 0.000000e+00 : f32
    %68 = vector.broadcast %cst_23 : f32 to vector<16x16xf32>
    %69 = arith.cmpf ogt, %67, %68 : vector<16x16xf32>
    %cst_24 = arith.constant 2.000000e-01 : f32
    %70 = vector.broadcast %cst_24 : f32 to vector<16x16xf32>
    %71 = arith.mulf %70, %67 : vector<16x16xf32>
    %72 = arith.select %69, %67, %71 : vector<16x16xi1>, vector<16x16xf32>
    %73 = arith.addf %72, %1 : vector<16x16xf32>
    %cst_25 = arith.constant dense<0xFF800000> : vector<16xf32>
    %74 = vector.multi_reduction <maximumf>, %73, %cst_25 [1] : vector<16x16xf32> to vector<16xf32>
    %75 = vector.shape_cast %74 : vector<16xf32> to vector<16x1xf32>
    %76 = vector.broadcast %75 : vector<16x1xf32> to vector<16x16xf32>
    %77 = arith.subf %73, %76 : vector<16x16xf32>
    %78 = math.exp %77 : vector<16x16xf32>
    %cst_26 = arith.constant dense<0.000000e+00> : vector<16xf32>
    %79 = vector.multi_reduction <add>, %78, %cst_26 [1] : vector<16x16xf32> to vector<16xf32>
    %80 = vector.shape_cast %79 : vector<16xf32> to vector<16x1xf32>
    %cst_27 = arith.constant 1.000000e-30 : f32
    %81 = vector.broadcast %cst_27 : f32 to vector<16x1xf32>
    %82 = arith.maximumf %80, %81 : vector<16x1xf32>
    %83 = arith.truncf %78 : vector<16x16xf32> to vector<16x16xbf16>
    %84 = vector.extract_strided_slice %4 {offsets = [0, 16], sizes = [16, 8], strides = [1, 1]} : vector<16x32xbf16> to vector<16x8xbf16>
    %cst_28 = arith.constant dense<0.000000e+00> : vector<16x8xf32>
    %85 = tpu.matmul %83, %84, %cst_28 {dimension_numbers = #tpu.dot_dimension_numbers<[1], [0], [0], [1], [0, 0, 1, 1], [], []>} : vector<16x16xbf16>, vector<16x8xbf16>, vector<16x8xf32> -> vector<16x8xf32>
    %86 = tpu.reciprocal %82 {approx = true} : vector<16x1xf32> -> vector<16x1xf32>
    %87 = vector.broadcast %86 : vector<16x1xf32> to vector<16x8xf32>
    %88 = arith.mulf %85, %87 : vector<16x8xf32>
    %cst_29 = arith.constant 0.000000e+00 : f32
    %89 = vector.broadcast %cst_29 : f32 to vector<16x8xf32>
    %90 = arith.maximumf %88, %89 : vector<16x8xf32>
    %c0_30 = arith.constant 0 : index
    %c16 = arith.constant 16 : index
    %91 = vector.load %arg5[%c0_30, %c16] : memref<16x32xf32, #tpu.memory_space<vmem>>, vector<16x8xf32>
    tpu.vector_store %arg5[%c0_30, %c16], %90 {strides = array<i32>} : memref<16x32xf32, #tpu.memory_space<vmem>>, vector<16x8xf32>,
    %92 = vector.extract_strided_slice %2 {offsets = [0, 3], sizes = [16, 1], strides = [1, 1]} : vector<16x4xf32> to vector<16x1xf32>
    %93 = vector.extract_strided_slice %3 {offsets = [3, 0], sizes = [1, 16], strides = [1, 1]} : vector<4x16xf32> to vector<1x16xf32>
    %94 = vector.broadcast %92 : vector<16x1xf32> to vector<16x16xf32>
    %95 = vector.broadcast %93 : vector<1x16xf32> to vector<16x16xf32>
    %96 = arith.addf %94, %95 : vector<16x16xf32>
    %cst_31 = arith.constant 0.000000e+00 : f32
    %97 = vector.broadcast %cst_31 : f32 to vector<16x16xf32>
    %98 = arith.cmpf ogt, %96, %97 : vector<16x16xf32>
    %cst_32 = arith.constant 2.000000e-01 : f32
    %99 = vector.broadcast %cst_32 : f32 to vector<16x16xf32>
    %100 = arith.mulf %99, %96 : vector<16x16xf32>
    %101 = arith.select %98, %96, %100 : vector<16x16xi1>, vector<16x16xf32>
    %102 = arith.addf %101, %1 : vector<16x16xf32>
    %cst_33 = arith.constant dense<0xFF800000> : vector<16xf32>
    %103 = vector.multi_reduction <maximumf>, %102, %cst_33 [1] : vector<16x16xf32> to vector<16xf32>
    %104 = vector.shape_cast %103 : vector<16xf32> to vector<16x1xf32>
    %105 = vector.broadcast %104 : vector<16x1xf32> to vector<16x16xf32>
    %106 = arith.subf %102, %105 : vector<16x16xf32>
    %107 = math.exp %106 : vector<16x16xf32>
    %cst_34 = arith.constant dense<0.000000e+00> : vector<16xf32>
    %108 = vector.multi_reduction <add>, %107, %cst_34 [1] : vector<16x16xf32> to vector<16xf32>
    %109 = vector.shape_cast %108 : vector<16xf32> to vector<16x1xf32>
    %cst_35 = arith.constant 1.000000e-30 : f32
    %110 = vector.broadcast %cst_35 : f32 to vector<16x1xf32>
    %111 = arith.maximumf %109, %110 : vector<16x1xf32>
    %112 = arith.truncf %107 : vector<16x16xf32> to vector<16x16xbf16>
    %113 = vector.extract_strided_slice %4 {offsets = [0, 24], sizes = [16, 8], strides = [1, 1]} : vector<16x32xbf16> to vector<16x8xbf16>
    %cst_36 = arith.constant dense<0.000000e+00> : vector<16x8xf32>
    %114 = tpu.matmul %112, %113, %cst_36 {dimension_numbers = #tpu.dot_dimension_numbers<[1], [0], [0], [1], [0, 0, 1, 1], [], []>} : vector<16x16xbf16>, vector<16x8xbf16>, vector<16x8xf32> -> vector<16x8xf32>
    %115 = tpu.reciprocal %111 {approx = true} : vector<16x1xf32> -> vector<16x1xf32>
    %116 = vector.broadcast %115 : vector<16x1xf32> to vector<16x8xf32>
    %117 = arith.mulf %114, %116 : vector<16x8xf32>
    %cst_37 = arith.constant 0.000000e+00 : f32
    %118 = vector.broadcast %cst_37 : f32 to vector<16x8xf32>
    %119 = arith.maximumf %117, %118 : vector<16x8xf32>
    %c0_38 = arith.constant 0 : index
    %c24 = arith.constant 24 : index
    %120 = vector.load %arg5[%c0_38, %c24] : memref<16x32xf32, #tpu.memory_space<vmem>>, vector<16x8xf32>
    tpu.vector_store %arg5[%c0_38, %c24], %119 {strides = array<i32>} : memref<16x32xf32, #tpu.memory_space<vmem>>, vector<16x8xf32>,
    return
  }
  func.func @transform_0(%arg0: i32) -> (i32, i32) {
    %c0_i32 = arith.constant 0 : i32
    %c0_i32_0 = arith.constant 0 : i32
    return %arg0, %c0_i32 : i32, i32
  }
  func.func @transform_1(%arg0: i32) -> (i32, i32) {
    %c0_i32 = arith.constant 0 : i32
    %c0_i32_0 = arith.constant 0 : i32
    %c0_i32_1 = arith.constant 0 : i32
    return %c0_i32, %c0_i32_0 : i32, i32
  }
  func.func @transform_2(%arg0: i32) -> (i32, i32) {
    %c0_i32 = arith.constant 0 : i32
    %c0_i32_0 = arith.constant 0 : i32
    return %arg0, %c0_i32 : i32, i32
  }
  func.func @transform_3(%arg0: i32) -> (i32, i32) {
    %c0_i32 = arith.constant 0 : i32
    %c0_i32_0 = arith.constant 0 : i32
    %c0_i32_1 = arith.constant 0 : i32
    return %c0_i32, %c0_i32_0 : i32, i32
  }
  func.func @transform_4(%arg0: i32) -> (i32, i32) {
    %c0_i32 = arith.constant 0 : i32
    %c0_i32_0 = arith.constant 0 : i32
    return %arg0, %c0_i32 : i32, i32
  }
}

module attributes {stable_mosaic.version = 11 : i64} {
  func.func @_gat_project_kernel(%arg0: i32, %arg1: memref<16x32xf32, #tpu.memory_space<vmem>>, %arg2: memref<32x32xbf16, #tpu.memory_space<vmem>>, %arg3: memref<32x4xf32, #tpu.memory_space<vmem>>, %arg4: memref<4x32xf32, #tpu.memory_space<vmem>>, %arg5: memref<16x32xbf16, #tpu.memory_space<vmem>>, %arg6: memref<16x4xf32, #tpu.memory_space<vmem>>, %arg7: memref<4x16xf32, #tpu.memory_space<vmem>>) attributes {dimension_semantics = [#tpu.dimension_semantics<parallel>], iteration_bounds = array<i64: 1>, scalar_prefetch = 0 : i64, scratch_operands = 0 : i64, tpu.core_type = #tpu.core_type<tc>, window_params = [{transform_indices = @transform_0, window_bounds = array<i64: 16, 32>}, {pipeline_mode = #tpu.pipeline_mode<synchronous>, transform_indices = @transform_1, window_bounds = array<i64: 32, 32>}, {pipeline_mode = #tpu.pipeline_mode<synchronous>, transform_indices = @transform_2, window_bounds = array<i64: 32, 4>}, {pipeline_mode = #tpu.pipeline_mode<synchronous>, transform_indices = @transform_3, window_bounds = array<i64: 4, 32>}, {transform_indices = @transform_4, window_bounds = array<i64: 16, 32>}, {transform_indices = @transform_5, window_bounds = array<i64: 16, 4>}, {transform_indices = @transform_6, window_bounds = array<i64: 4, 16>}]} {
    %c0 = arith.constant 0 : index
    %c0_0 = arith.constant 0 : index
    %0 = vector.load %arg1[%c0, %c0_0] : memref<16x32xf32, #tpu.memory_space<vmem>>, vector<16x32xf32>
    %1 = arith.truncf %0 : vector<16x32xf32> to vector<16x32xbf16>
    %c0_1 = arith.constant 0 : index
    %c0_2 = arith.constant 0 : index
    %2 = vector.load %arg2[%c0_1, %c0_2] : memref<32x32xbf16, #tpu.memory_space<vmem>>, vector<32x32xbf16>
    %cst = arith.constant dense<0.000000e+00> : vector<16x32xf32>
    %3 = tpu.matmul %1, %2, %cst {dimension_numbers = #tpu.dot_dimension_numbers<[1], [0], [0], [1], [0, 0, 1, 1], [], []>} : vector<16x32xbf16>, vector<32x32xbf16>, vector<16x32xf32> -> vector<16x32xf32>
    %4 = arith.truncf %3 : vector<16x32xf32> to vector<16x32xbf16>
    %c0_3 = arith.constant 0 : index
    %c0_4 = arith.constant 0 : index
    %5 = vector.load %arg3[%c0_3, %c0_4] : memref<32x4xf32, #tpu.memory_space<vmem>>, vector<32x4xf32>
    %6 = arith.truncf %5 : vector<32x4xf32> to vector<32x4xbf16>
    %cst_5 = arith.constant dense<0.000000e+00> : vector<16x4xf32>
    %7 = tpu.matmul %4, %6, %cst_5 {dimension_numbers = #tpu.dot_dimension_numbers<[1], [0], [0], [1], [0, 0, 1, 1], [], []>} : vector<16x32xbf16>, vector<32x4xbf16>, vector<16x4xf32> -> vector<16x4xf32>
    %c0_6 = arith.constant 0 : index
    %c0_7 = arith.constant 0 : index
    %8 = vector.load %arg6[%c0_6, %c0_7] : memref<16x4xf32, #tpu.memory_space<vmem>>, vector<16x4xf32>
    tpu.vector_store %arg6[%c0_6, %c0_7], %7 {strides = array<i32>} : memref<16x4xf32, #tpu.memory_space<vmem>>, vector<16x4xf32>,
    %c0_8 = arith.constant 0 : index
    %c0_9 = arith.constant 0 : index
    %9 = vector.load %arg4[%c0_8, %c0_9] : memref<4x32xf32, #tpu.memory_space<vmem>>, vector<4x32xf32>
    %10 = arith.truncf %9 : vector<4x32xf32> to vector<4x32xbf16>
    %cst_10 = arith.constant dense<0.000000e+00> : vector<4x16xf32>
    %11 = tpu.matmul %10, %4, %cst_10 {dimension_numbers = #tpu.dot_dimension_numbers<[1], [1], [0], [0], [0, 0, 1, 0], [], []>} : vector<4x32xbf16>, vector<16x32xbf16>, vector<4x16xf32> -> vector<4x16xf32>
    %c0_11 = arith.constant 0 : index
    %c0_12 = arith.constant 0 : index
    %12 = vector.load %arg7[%c0_11, %c0_12] : memref<4x16xf32, #tpu.memory_space<vmem>>, vector<4x16xf32>
    tpu.vector_store %arg7[%c0_11, %c0_12], %11 {strides = array<i32>} : memref<4x16xf32, #tpu.memory_space<vmem>>, vector<4x16xf32>,
    %c0_13 = arith.constant 0 : index
    %c0_14 = arith.constant 0 : index
    %13 = vector.load %arg5[%c0_13, %c0_14] : memref<16x32xbf16, #tpu.memory_space<vmem>>, vector<16x32xbf16>
    tpu.vector_store %arg5[%c0_13, %c0_14], %4 {strides = array<i32>} : memref<16x32xbf16, #tpu.memory_space<vmem>>, vector<16x32xbf16>,
    return
  }
  func.func @transform_0(%arg0: i32) -> (i32, i32) {
    %c0_i32 = arith.constant 0 : i32
    %c0_i32_0 = arith.constant 0 : i32
    return %arg0, %c0_i32 : i32, i32
  }
  func.func @transform_1(%arg0: i32) -> (i32, i32) {
    %c0_i32 = arith.constant 0 : i32
    %c0_i32_0 = arith.constant 0 : i32
    %c0_i32_1 = arith.constant 0 : i32
    return %c0_i32, %c0_i32_0 : i32, i32
  }
  func.func @transform_2(%arg0: i32) -> (i32, i32) {
    %c0_i32 = arith.constant 0 : i32
    %c0_i32_0 = arith.constant 0 : i32
    %c0_i32_1 = arith.constant 0 : i32
    return %c0_i32, %c0_i32_0 : i32, i32
  }
  func.func @transform_3(%arg0: i32) -> (i32, i32) {
    %c0_i32 = arith.constant 0 : i32
    %c0_i32_0 = arith.constant 0 : i32
    %c0_i32_1 = arith.constant 0 : i32
    return %c0_i32, %c0_i32_0 : i32, i32
  }
  func.func @transform_4(%arg0: i32) -> (i32, i32) {
    %c0_i32 = arith.constant 0 : i32
    %c0_i32_0 = arith.constant 0 : i32
    return %arg0, %c0_i32 : i32, i32
  }
  func.func @transform_5(%arg0: i32) -> (i32, i32) {
    %c0_i32 = arith.constant 0 : i32
    %c0_i32_0 = arith.constant 0 : i32
    return %arg0, %c0_i32 : i32, i32
  }
  func.func @transform_6(%arg0: i32) -> (i32, i32) {
    %c0_i32 = arith.constant 0 : i32
    %c0_i32_0 = arith.constant 0 : i32
    return %c0_i32, %arg0 : i32, i32
  }
}

module attributes {stable_mosaic.version = 11 : i64} {
  func.func @_gat_attend_kernel(%arg0: i32, %arg1: memref<16x1xf32, #tpu.memory_space<vmem>>, %arg2: memref<1x16xf32, #tpu.memory_space<vmem>>, %arg3: memref<16x16xbf16, #tpu.memory_space<vmem>>, %arg4: memref<16x8xbf16, #tpu.memory_space<vmem>>, %arg5: memref<16x8xf32, #tpu.memory_space<vmem>>) attributes {dimension_semantics = [#tpu.dimension_semantics<parallel>], iteration_bounds = array<i64: 1>, scalar_prefetch = 0 : i64, scratch_operands = 0 : i64, tpu.core_type = #tpu.core_type<tc>, window_params = [{transform_indices = @transform_0, window_bounds = array<i64: 16, 1>}, {pipeline_mode = #tpu.pipeline_mode<synchronous>, transform_indices = @transform_1, window_bounds = array<i64: 1, 16>}, {transform_indices = @transform_2, window_bounds = array<i64: 16, 16>}, {pipeline_mode = #tpu.pipeline_mode<synchronous>, transform_indices = @transform_3, window_bounds = array<i64: 16, 8>}, {transform_indices = @transform_4, window_bounds = array<i64: 16, 8>}]} {
    %c0 = arith.constant 0 : index
    %c0_0 = arith.constant 0 : index
    %0 = vector.load %arg3[%c0, %c0_0] : memref<16x16xbf16, #tpu.memory_space<vmem>>, vector<16x16xbf16>
    %1 = arith.extf %0 : vector<16x16xbf16> to vector<16x16xf32>
    %c0_1 = arith.constant 0 : index
    %c0_2 = arith.constant 0 : index
    %2 = vector.load %arg1[%c0_1, %c0_2] : memref<16x1xf32, #tpu.memory_space<vmem>>, vector<16x1xf32>
    %c0_3 = arith.constant 0 : index
    %c0_4 = arith.constant 0 : index
    %3 = vector.load %arg2[%c0_3, %c0_4] : memref<1x16xf32, #tpu.memory_space<vmem>>, vector<1x16xf32>
    %c0_5 = arith.constant 0 : index
    %c0_6 = arith.constant 0 : index
    %4 = vector.load %arg4[%c0_5, %c0_6] : memref<16x8xbf16, #tpu.memory_space<vmem>>, vector<16x8xbf16>
    %5 = vector.broadcast %2 : vector<16x1xf32> to vector<16x16xf32>
    %6 = vector.broadcast %3 : vector<1x16xf32> to vector<16x16xf32>
    %7 = arith.addf %5, %6 : vector<16x16xf32>
    %cst = arith.constant 0.000000e+00 : f32
    %8 = vector.broadcast %cst : f32 to vector<16x16xf32>
    %9 = arith.cmpf ogt, %7, %8 : vector<16x16xf32>
    %cst_7 = arith.constant 2.000000e-01 : f32
    %10 = vector.broadcast %cst_7 : f32 to vector<16x16xf32>
    %11 = arith.mulf %10, %7 : vector<16x16xf32>
    %12 = arith.select %9, %7, %11 : vector<16x16xi1>, vector<16x16xf32>
    %13 = arith.addf %12, %1 : vector<16x16xf32>
    %cst_8 = arith.constant dense<0xFF800000> : vector<16xf32>
    %14 = vector.multi_reduction <maximumf>, %13, %cst_8 [1] : vector<16x16xf32> to vector<16xf32>
    %15 = vector.shape_cast %14 : vector<16xf32> to vector<16x1xf32>
    %16 = vector.broadcast %15 : vector<16x1xf32> to vector<16x16xf32>
    %17 = arith.subf %13, %16 : vector<16x16xf32>
    %18 = math.exp %17 : vector<16x16xf32>
    %cst_9 = arith.constant dense<0.000000e+00> : vector<16xf32>
    %19 = vector.multi_reduction <add>, %18, %cst_9 [1] : vector<16x16xf32> to vector<16xf32>
    %20 = vector.shape_cast %19 : vector<16xf32> to vector<16x1xf32>
    %cst_10 = arith.constant 1.000000e-30 : f32
    %21 = vector.broadcast %cst_10 : f32 to vector<16x1xf32>
    %22 = arith.maximumf %20, %21 : vector<16x1xf32>
    %23 = arith.truncf %18 : vector<16x16xf32> to vector<16x16xbf16>
    %cst_11 = arith.constant dense<0.000000e+00> : vector<16x8xf32>
    %24 = tpu.matmul %23, %4, %cst_11 {dimension_numbers = #tpu.dot_dimension_numbers<[1], [0], [0], [1], [0, 0, 1, 1], [], []>} : vector<16x16xbf16>, vector<16x8xbf16>, vector<16x8xf32> -> vector<16x8xf32>
    %25 = tpu.reciprocal %22 {approx = true} : vector<16x1xf32> -> vector<16x1xf32>
    %26 = vector.broadcast %25 : vector<16x1xf32> to vector<16x8xf32>
    %27 = arith.mulf %24, %26 : vector<16x8xf32>
    %c0_12 = arith.constant 0 : index
    %c0_13 = arith.constant 0 : index
    %28 = vector.load %arg5[%c0_12, %c0_13] : memref<16x8xf32, #tpu.memory_space<vmem>>, vector<16x8xf32>
    tpu.vector_store %arg5[%c0_12, %c0_13], %27 {strides = array<i32>} : memref<16x8xf32, #tpu.memory_space<vmem>>, vector<16x8xf32>,
    %c0_14 = arith.constant 0 : index
    %c0_15 = arith.constant 0 : index
    %29 = vector.load %arg5[%c0_14, %c0_15] : memref<16x8xf32, #tpu.memory_space<vmem>>, vector<16x8xf32>
    %cst_16 = arith.constant dense<0xFF800000> : vector<16xf32>
    %30 = vector.multi_reduction <maximumf>, %29, %cst_16 [1] : vector<16x8xf32> to vector<16xf32>
    %31 = vector.shape_cast %30 : vector<16xf32> to vector<16x1xf32>
    %32 = vector.broadcast %31 : vector<16x1xf32> to vector<16x8xf32>
    %33 = arith.subf %29, %32 : vector<16x8xf32>
    %34 = math.exp %33 : vector<16x8xf32>
    %cst_17 = arith.constant dense<0.000000e+00> : vector<16xf32>
    %35 = vector.multi_reduction <add>, %34, %cst_17 [1] : vector<16x8xf32> to vector<16xf32>
    %36 = vector.shape_cast %35 : vector<16xf32> to vector<16x1xf32>
    %37 = math.log %36 : vector<16x1xf32>
    %38 = vector.broadcast %37 : vector<16x1xf32> to vector<16x8xf32>
    %39 = arith.subf %33, %38 : vector<16x8xf32>
    %c0_18 = arith.constant 0 : index
    %c0_19 = arith.constant 0 : index
    %40 = vector.load %arg5[%c0_18, %c0_19] : memref<16x8xf32, #tpu.memory_space<vmem>>, vector<16x8xf32>
    tpu.vector_store %arg5[%c0_18, %c0_19], %39 {strides = array<i32>} : memref<16x8xf32, #tpu.memory_space<vmem>>, vector<16x8xf32>,
    return
  }
  func.func @transform_0(%arg0: i32) -> (i32, i32) {
    %c0_i32 = arith.constant 0 : i32
    %c0_i32_0 = arith.constant 0 : i32
    return %arg0, %c0_i32 : i32, i32
  }
  func.func @transform_1(%arg0: i32) -> (i32, i32) {
    %c0_i32 = arith.constant 0 : i32
    %c0_i32_0 = arith.constant 0 : i32
    %c0_i32_1 = arith.constant 0 : i32
    return %c0_i32, %c0_i32_0 : i32, i32
  }
  func.func @transform_2(%arg0: i32) -> (i32, i32) {
    %c0_i32 = arith.constant 0 : i32
    %c0_i32_0 = arith.constant 0 : i32
    return %arg0, %c0_i32 : i32, i32
  }
  func.func @transform_3(%arg0: i32) -> (i32, i32) {
    %c0_i32 = arith.constant 0 : i32
    %c0_i32_0 = arith.constant 0 : i32
    %c0_i32_1 = arith.constant 0 : i32
    return %c0_i32, %c0_i32_0 : i32, i32
  }
  func.func @transform_4(%arg0: i32) -> (i32, i32) {
    %c0_i32 = arith.constant 0 : i32
    %c0_i32_0 = arith.constant 0 : i32
    return %arg0, %c0_i32 : i32, i32
  }
}

module attributes {stable_mosaic.version = 11 : i64} {
  func.func @_gat_project_kernel(%arg0: i32, %arg1: memref<16x32xf32, #tpu.memory_space<vmem>>, %arg2: memref<32x8xbf16, #tpu.memory_space<vmem>>, %arg3: memref<8x1xf32, #tpu.memory_space<vmem>>, %arg4: memref<1x8xf32, #tpu.memory_space<vmem>>, %arg5: memref<16x8xbf16, #tpu.memory_space<vmem>>, %arg6: memref<16x1xf32, #tpu.memory_space<vmem>>, %arg7: memref<1x16xf32, #tpu.memory_space<vmem>>) attributes {dimension_semantics = [#tpu.dimension_semantics<parallel>], iteration_bounds = array<i64: 1>, scalar_prefetch = 0 : i64, scratch_operands = 0 : i64, tpu.core_type = #tpu.core_type<tc>, window_params = [{transform_indices = @transform_0, window_bounds = array<i64: 16, 32>}, {pipeline_mode = #tpu.pipeline_mode<synchronous>, transform_indices = @transform_1, window_bounds = array<i64: 32, 8>}, {pipeline_mode = #tpu.pipeline_mode<synchronous>, transform_indices = @transform_2, window_bounds = array<i64: 8, 1>}, {pipeline_mode = #tpu.pipeline_mode<synchronous>, transform_indices = @transform_3, window_bounds = array<i64: 1, 8>}, {transform_indices = @transform_4, window_bounds = array<i64: 16, 8>}, {transform_indices = @transform_5, window_bounds = array<i64: 16, 1>}, {transform_indices = @transform_6, window_bounds = array<i64: 1, 16>}]} {
    %c0 = arith.constant 0 : index
    %c0_0 = arith.constant 0 : index
    %0 = vector.load %arg1[%c0, %c0_0] : memref<16x32xf32, #tpu.memory_space<vmem>>, vector<16x32xf32>
    %1 = arith.truncf %0 : vector<16x32xf32> to vector<16x32xbf16>
    %c0_1 = arith.constant 0 : index
    %c0_2 = arith.constant 0 : index
    %2 = vector.load %arg2[%c0_1, %c0_2] : memref<32x8xbf16, #tpu.memory_space<vmem>>, vector<32x8xbf16>
    %cst = arith.constant dense<0.000000e+00> : vector<16x8xf32>
    %3 = tpu.matmul %1, %2, %cst {dimension_numbers = #tpu.dot_dimension_numbers<[1], [0], [0], [1], [0, 0, 1, 1], [], []>} : vector<16x32xbf16>, vector<32x8xbf16>, vector<16x8xf32> -> vector<16x8xf32>
    %4 = arith.truncf %3 : vector<16x8xf32> to vector<16x8xbf16>
    %c0_3 = arith.constant 0 : index
    %c0_4 = arith.constant 0 : index
    %5 = vector.load %arg3[%c0_3, %c0_4] : memref<8x1xf32, #tpu.memory_space<vmem>>, vector<8x1xf32>
    %6 = arith.truncf %5 : vector<8x1xf32> to vector<8x1xbf16>
    %cst_5 = arith.constant dense<0.000000e+00> : vector<16x1xf32>
    %7 = tpu.matmul %4, %6, %cst_5 {dimension_numbers = #tpu.dot_dimension_numbers<[1], [0], [0], [1], [0, 0, 1, 1], [], []>} : vector<16x8xbf16>, vector<8x1xbf16>, vector<16x1xf32> -> vector<16x1xf32>
    %c0_6 = arith.constant 0 : index
    %c0_7 = arith.constant 0 : index
    %8 = vector.load %arg6[%c0_6, %c0_7] : memref<16x1xf32, #tpu.memory_space<vmem>>, vector<16x1xf32>
    tpu.vector_store %arg6[%c0_6, %c0_7], %7 {strides = array<i32>} : memref<16x1xf32, #tpu.memory_space<vmem>>, vector<16x1xf32>,
    %c0_8 = arith.constant 0 : index
    %c0_9 = arith.constant 0 : index
    %9 = vector.load %arg4[%c0_8, %c0_9] : memref<1x8xf32, #tpu.memory_space<vmem>>, vector<1x8xf32>
    %10 = arith.truncf %9 : vector<1x8xf32> to vector<1x8xbf16>
    %cst_10 = arith.constant dense<0.000000e+00> : vector<1x16xf32>
    %11 = tpu.matmul %10, %4, %cst_10 {dimension_numbers = #tpu.dot_dimension_numbers<[1], [1], [0], [0], [0, 0, 1, 0], [], []>} : vector<1x8xbf16>, vector<16x8xbf16>, vector<1x16xf32> -> vector<1x16xf32>
    %c0_11 = arith.constant 0 : index
    %c0_12 = arith.constant 0 : index
    %12 = vector.load %arg7[%c0_11, %c0_12] : memref<1x16xf32, #tpu.memory_space<vmem>>, vector<1x16xf32>
    tpu.vector_store %arg7[%c0_11, %c0_12], %11 {strides = array<i32>} : memref<1x16xf32, #tpu.memory_space<vmem>>, vector<1x16xf32>,
    %c0_13 = arith.constant 0 : index
    %c0_14 = arith.constant 0 : index
    %13 = vector.load %arg5[%c0_13, %c0_14] : memref<16x8xbf16, #tpu.memory_space<vmem>>, vector<16x8xbf16>
    tpu.vector_store %arg5[%c0_13, %c0_14], %4 {strides = array<i32>} : memref<16x8xbf16, #tpu.memory_space<vmem>>, vector<16x8xbf16>,
    return
  }
  func.func @transform_0(%arg0: i32) -> (i32, i32) {
    %c0_i32 = arith.constant 0 : i32
    %c0_i32_0 = arith.constant 0 : i32
    return %arg0, %c0_i32 : i32, i32
  }
  func.func @transform_1(%arg0: i32) -> (i32, i32) {
    %c0_i32 = arith.constant 0 : i32
    %c0_i32_0 = arith.constant 0 : i32
    %c0_i32_1 = arith.constant 0 : i32
    return %c0_i32, %c0_i32_0 : i32, i32
  }
  func.func @transform_2(%arg0: i32) -> (i32, i32) {
    %c0_i32 = arith.constant 0 : i32
    %c0_i32_0 = arith.constant 0 : i32
    %c0_i32_1 = arith.constant 0 : i32
    return %c0_i32, %c0_i32_0 : i32, i32
  }
  func.func @transform_3(%arg0: i32) -> (i32, i32) {
    %c0_i32 = arith.constant 0 : i32
    %c0_i32_0 = arith.constant 0 : i32
    %c0_i32_1 = arith.constant 0 : i32
    return %c0_i32, %c0_i32_0 : i32, i32
  }
  func.func @transform_4(%arg0: i32) -> (i32, i32) {
    %c0_i32 = arith.constant 0 : i32
    %c0_i32_0 = arith.constant 0 : i32
    return %arg0, %c0_i32 : i32, i32
  }
  func.func @transform_5(%arg0: i32) -> (i32, i32) {
    %c0_i32 = arith.constant 0 : i32
    %c0_i32_0 = arith.constant 0 : i32
    return %arg0, %c0_i32 : i32, i32
  }
  func.func @transform_6(%arg0: i32) -> (i32, i32) {
    %c0_i32 = arith.constant 0 : i32
    %c0_i32_0 = arith.constant 0 : i32
    return %c0_i32, %arg0 : i32, i32
  }
}

</mosaic_0001>

<bundles_post_ra>
// kernel: net_forward.6
= control target key start
LH: loop header
LB: loop body
LE: loop exit
PB: predicated region body
PF: predicated region fallthrough
CT: control target
= control target key end

     0   :  { %v239_v0 = vmov 0.0   ;;  %vm240_vm0 = vmmov 0   ;;  %vm32_vm1 = vcmask 130048   ;;  %vm186_vm2 = vcmask 257024   ;;  %s318_s1 = inlined_call_operand.vmem [shape: bf16[16,32], index: 1, kind: input, shape index: {}]   ;;  %s319_s0 = inlined_call_operand.vmem [shape: f32[16,16], index: 0, kind: input, shape index: {}]   ;;  %s320_s2 = inlined_call_operand.vmem [shape: f32[32,4], index: 2, kind: input, shape index: {}]   ;;  %s321_s4 = inlined_call_operand.vmem [shape: bf16[16,32], index: 4, kind: output, shape index: {0}]   ;;  %s322_s3 = inlined_call_operand.vmem [shape: f32[4,32], index: 3, kind: input, shape index: {}]   ;;  %s323_s5 = inlined_call_operand.vmem [shape: f32[16,4], index: 5, kind: output, shape index: {1}]   ;;  %s324_s6 = inlined_call_operand.vmem [shape: f32[4,16], index: 6, kind: output, shape index: {2}]  }
   0x1   :  { %216 = vmatprep.subr.bf16.mxu0 %v239_v0  ;;  %v238_v1 = vld [vmem:[%s318_s1] sm:$0xff]   ;;  %218 = vmatprep.mubr.msk.bf16.mxu0 %vm240_vm0, %v239_v0  ;;  %v22_v3 = vld [vmem:[%s319_s0 + $0x8] sm:$0xff]  ;;  %v80_v8 = vld [vmem:[%s320_s2 + $0x10] sm:$0xff]  ;;  %vm84_vm3 = vcmask 261120   ;;  %vm129_vm4 = vcmask 31744   ;;  %vm177_vm5 = vcmask 125952  }
   0x2   :  { %v21_v2 = vld [vmem:[%s319_s0] sm:$0xff]  ;;  %222 = vmatprep.subr.bf16.mxu1 %v239_v0  ;;  %226 = vmatprep.mubr.msk.bf16.mxu1 %vm240_vm0, %v239_v0  ;;  %v79_v6 = vld [vmem:[%s320_s2 + $0x8] sm:$0xff]  ;;  %v81_v9 = vld [vmem:[%s320_s2 + $0x18] sm:$0xff] }
   0x3   :  { %v78_v4 = vld [vmem:[%s320_s2] sm:$0xff]  ;;  %217 = vmatpush3.bf16.msra.mxu0 %v238_v1  ;;  %v23_v5 = vpack.c.bf16 %v22_v3, %v21_v2  ;;  %v83_v10 = vpack.c.bf16 %v81_v9, %v80_v8 }
   0x4   :  { %v82_v7 = vpack.c.bf16 %v79_v6, %v78_v4  ;;  %230 = vmatprep.subr.bf16.mxu0 %v239_v0  ;;  %v132_v19 = vld [vmem:[%s322_s3] sm:$0xf] }
   0x5   :  { %v133_v20 = vpack.c.bf16 %v132_v19, %v132_v19 }
   0x6   :  { %219 = vmatmul.mubr.msk.bf16.vlgmr.msra.gmra.mrb[0].mxu0 %vm32_vm1, %v23_v5  ;;  %223 = vmatpush3.bf16.msra.mxu1 %v82_v7 }
   0x7   :  { %224 = vmatprep.subr.bf16.mxu1 %v239_v0  ;;  %232 = vmatprep.mubr.msk.bf16.mxu0 %vm240_vm0, %v239_v0 }
   0xa   :  { %225 = vmatpush3.bf16.msra.mxu1 %v83_v10 }
  0xd9   :  { %v70_v11 = vpop.f32.mrb[0].mxu0 }
  0xda   :  { %v207_v12 = vpack.c.bf16 %v70_v11, %v70_v11  ;;  %v220_v13 = vpop.f32.mrb[1].mxu0 }
  0xdb   :  { %v73_v14 = vpop.f32.mrb[2].mxu0 }
  0xdc   :  { %187 = vst.msk [vmem:[%s321_s4] sm:$0xf] %vm186_vm2, %v207_v12  ;;  %v77_v15 = vpack.c.bf16 %v73_v14, %v70_v11  ;;  %v208_v16 = vpack.c.bf16 %v73_v14, %v73_v14  ;;  %v221_v17 = vpop.f32.mrb[3].mxu0 }
  0xde   :  { %188 = vst.msk [vmem:[%s321_s4 + $0x4] sm:$0xf] %vm186_vm2, %v208_v16  ;;  %227 = vmatmul.mubr.msk.bf16.vlgmr.msra.gmra.mrb[0].mxu1 %vm84_vm3, %v77_v15  ;;  %v86_v18 = vsel %vm84_vm3, %v77_v15, 0 }
  0xdf   :  { %231 = vmatpush3.bf16.xpose.msra.mxu0 %v86_v18 }
  0xe6   :  { %233 = vmatmul.mubr.msk.bf16.vlgmr.msra.gmra.mrb[4].mxu0 %vm84_vm3, %v133_v20 }
 0x1b1   :  { %v122_v21 = vpop.f32.mrb[0].mxu1 }
 0x1b2   :  { %130 = vst.msk [vmem:[%s323_s5] sm:$0xff] %vm129_vm4, %v122_v21  ;;  %v228_v22 = vpop.f32.mrb[1].mxu1 }
 0x1b3   :  { %v125_v23 = vpop.f32.mrb[2].mxu1 }
 0x1b4   :  { %131 = vst.msk [vmem:[%s323_s5 + $0x8] sm:$0xff] %vm129_vm4, %v125_v23  ;;  %v229_v24 = vpop.f32.mrb[3].mxu1 }
 0x1b9   :  { %v171_v25 = vpop.f32.mrb[4].mxu0 }
 0x1ba   :  { %178 = vst.msk [vmem:[%s324_s6] sm:$0xf] %vm177_vm5, %v171_v25  ;;  %v234_v26 = vpop.f32.mrb[5].mxu0 }
 0x1bb   :  { %v174_v27 = vpop.f32.mrb[6].mxu0 }
 0x1bc   :  { %v235_v28 = vpop.f32.mrb[7].mxu0 }

// kernel: net_forward.7
= control target key start
LH: loop header
LB: loop body
LE: loop exit
PB: predicated region body
PF: predicated region fallthrough
CT: control target
= control target key end

     0   :  { %v613_v0 = vmov 1   ;;  %v614_v1 = vmov 0   ;;  %v615_v4 = vmov 2   ;;  %v616_v5 = vmov 3   ;;  %s617_s21 = smov 120   ;;  %s622_s28 = smov 8   ;;  %s735_s0 = inlined_call_operand.vmem [shape: f32[16,4], index: 0, kind: input, shape index: {}]   ;;  %s736_s3 = inlined_call_operand.vmem [shape: bf16[16,32], index: 3, kind: input, shape index: {}]   ;;  %s737_s1 = inlined_call_operand.vmem [shape: f32[4,16], index: 1, kind: input, shape index: {}]   ;;  %s738_s2 = inlined_call_operand.vmem [shape: bf16[16,16], index: 2, kind: input, shape index: {}]   ;;  %s739_s4 = inlined_call_operand.vmem [shape: f32[16,32], index: 4, kind: output, shape index: {}]  }
   0x1   :  { %559 = vset.pattern.permute.xlu1 %v613_v0  ;;  %558 = vset.pattern.permute.xlu0 %v614_v1  ;;  %v22_v2 = vld [vmem:[%s735_s0] sm:$0xff]  ;;  %v23_v3 = vld [vmem:[%s735_s0 + $0x8] sm:$0xff]  ;;  %v618_v7 = vmov 0.0   ;;  %v37_v8 = vlaneseq  ;;  %vm51_vm2 = vcmask 130048   ;;  %vm620_vm9 = vmmov 0   ;;  %s623_s29 = smov 16  }
   0x2   :  { %143 = vperm.xlu1 %559, %v22_v2   ;;  %29 = vperm.xlu0 %558, %v22_v2   ;;  %v659_v6 = vld [vmem:[%s736_s3] sm:$0xff]   ;;  %vm139_vm10 = vcmask 64512   ;;  %s624_s30 = smov 24  }
   0x3   :  { %528 = vmatprep.subr.bf16.mxu1 %v618_v7  ;;  %522 = vmatprep.subr.bf16.mxu0 %v618_v7  ;;  %v38_v9 = vshrl.u32 %v37_v8, 7  ;;  %v24_v12 = vld [vmem:[%s737_s1] sm:$0xf]  ;;  %s619_s1 = smov 104  }
   0x4   :  { %523 = vmatpush3.bf16.msra.mxu0 %v659_v6  ;;  %v511_v15 = vld [vmem:[%s738_s2] sm:$0xff]   ;;  %524 = vmatprep.mubr.msk.bf16.mxu0 %vm620_vm9, %v618_v7  ;;  %s621_s2 = smov 112  }
   0x5   :  { %534 = vmatprep.subr.bf16.mxu0 %v618_v7  ;;  %v152_v10 = vsub.s32 1, %v38_v9  ;;  %v39_v11 = vsub.s32 0, %v38_v9  ;;  %v269_v18 = vsub.s32 2, %v38_v9  ;;  %v512_v21 = vunpack.c.l.bf16 %v511_v15  ;;  %530 = vmatprep.mubr.msk.bf16.mxu1 %vm620_vm9, %v618_v7 }
   0x6   :  { %147 = vperm.xlu1 %559, %v23_v3   ;;  %34 = vperm.xlu0 %558, %v23_v3   ;;  %v513_v33 = vunpack.c.h.bf16 %v511_v15  ;;  %v386_v34 = vsub.s32 3, %v38_v9 }
   0x7   :  { %v153_v13 = vrot.slane %v24_v12, %v152_v10  ;;  %v40_v14 = vrot.slane %v24_v12, %v39_v11  ;;  %v270_v26 = vrot.slane %v24_v12, %v269_v18 }
   0x8   :  { %v387_v46 = vrot.slane %v24_v12, %v386_v34 }
   0xa   :  { %561 = vset.pattern.permute.xlu1 %v615_v4  ;;  %560 = vset.pattern.permute.xlu0 %v615_v4 }
   0xb   :  { %264 = vperm.xlu1 %561, %v23_v3   ;;  %260 = vperm.xlu0 %560, %v22_v2  }
   0xf   :  { %562 = vset.pattern.permute.xlu1 %v616_v5  ;;  %563 = vset.pattern.permute.xlu0 %v616_v5 }
  0x10   :  { %377 = vperm.xlu1 %562, %v22_v2   ;;  %381 = vperm.xlu0 %563, %v23_v3  }
  0x14   :  { %185 = vrot.lane.b32.xlu1 %v659_v6, %s617_s21 }
  0x81   :  { %v144_v16 = vpop.permute.xlu1 %143  ;;  %v30_v17 = vpop.permute.xlu0 %29 }
  0x82   :  { %v154_v19 = vadd.f32 %v153_v13, %v144_v16  ;;  %v41_v20 = vadd.f32 %v40_v14, %v30_v17 }
  0x84   :  { %vm156_vm0 = vcmp.gt.f32.partialorder %v154_v19, 0.0  ;;  %v158_v22 = vmul.f32 0.2, %v154_v19  ;;  %vm43_vm1 = vcmp.gt.f32.partialorder %v41_v20, 0.0  ;;  %v45_v23 = vmul.f32 0.2, %v41_v20 }
  0x85   :  { %v148_v24 = vpop.permute.xlu1 %147  ;;  %v35_v25 = vpop.permute.xlu0 %34 }
  0x86   :  { %v155_v27 = vadd.f32 %v153_v13, %v148_v24  ;;  %v42_v28 = vadd.f32 %v40_v14, %v35_v25  ;;  %v47_v29 = vsel %vm43_vm1, %v41_v20, %v45_v23  ;;  %v160_v30 = vsel %vm156_vm0, %v154_v19, %v158_v22 }
  0x87   :  { %v672_v31 = vadd.f32 %v512_v21, %v47_v29  ;;  %v674_v32 = vadd.f32 %v512_v21, %v160_v30 }
  0x88   :  { %vm157_vm3 = vcmp.gt.f32.partialorder %v155_v27, 0.0  ;;  %v159_v35 = vmul.f32 0.2, %v155_v27  ;;  %vm44_vm4 = vcmp.gt.f32.partialorder %v42_v28, 0.0  ;;  %v46_v36 = vmul.f32 0.2, %v42_v28 }
  0x89   :  { %v52_v37 = vsel %vm51_vm2, %v672_v31, -inf  ;;  %v164_v45 = vsel %vm51_vm2, %v674_v32, -inf }
  0x8a   :  { %v265_v38 = vpop.permute.xlu1 %264  ;;  %53 = vmax.xlane.f32.xlu1 %v52_v37  ;;  %v261_v39 = vpop.permute.xlu0 %260  ;;  %v48_v40 = vsel %vm44_vm4, %v42_v28, %v46_v36  ;;  %v161_v41 = vsel %vm157_vm3, %v155_v27, %v159_v35  ;;  %vm256_vm3 = vcmask 130112   ;;  %vm373_vm4 = vcmask 195712  }
  0x8b   :  { %v272_v42 = vadd.f32 %v270_v26, %v265_v38  ;;  %v271_v43 = vadd.f32 %v270_v26, %v261_v39  ;;  %v50_v44 = vadd.f32 %v513_v33, %v48_v40  ;;  %v163_v47 = vadd.f32 %v513_v33, %v161_v41 }
  0x8d   :  { %vm274_vm5 = vcmp.gt.f32.partialorder %v272_v42, 0.0  ;;  %v276_v48 = vmul.f32 0.2, %v272_v42  ;;  %vm273_vm6 = vcmp.gt.f32.partialorder %v271_v43, 0.0  ;;  %v275_v49 = vmul.f32 0.2, %v271_v43 }
  0x8e   :  { %165 = vmax.xlane.f32.xlu1 %v164_v45  ;;  %v55_v50 = vsel %vm51_vm2, %v50_v44, -inf  ;;  %v167_v58 = vsel %vm51_vm2, %v163_v47, -inf }
  0x8f   :  { %56 = vmax.xlane.f32.xlu0 %v55_v50  ;;  %v378_v51 = vpop.permute.xlu1 %377  ;;  %v382_v52 = vpop.permute.xlu0 %381  ;;  %v277_v53 = vsel %vm273_vm6, %v271_v43, %v275_v49  ;;  %v278_v54 = vsel %vm274_vm5, %v272_v42, %v276_v48  ;;  %vm490_vm5 = vcmask 261312  }
  0x90   :  { %v388_v55 = vadd.f32 %v387_v46, %v378_v51  ;;  %v389_v56 = vadd.f32 %v387_v46, %v382_v52  ;;  %v279_v57 = vadd.f32 %v512_v21, %v277_v53  ;;  %v280_v59 = vadd.f32 %v513_v33, %v278_v54 }
  0x92   :  { %vm390_vm7 = vcmp.gt.f32.partialorder %v388_v55, 0.0  ;;  %v392_v60 = vmul.f32 0.2, %v388_v55  ;;  %vm391_vm8 = vcmp.gt.f32.partialorder %v389_v56, 0.0  ;;  %v393_v61 = vmul.f32 0.2, %v389_v56 }
  0x93   :  { %168 = vmax.xlane.f32.xlu0 %v167_v58  ;;  %v281_v62 = vsel %vm51_vm2, %v279_v57, -inf  ;;  %v186_v63 = vpop.permute.xlu1 %185  ;;  %v284_v3 = vsel %vm51_vm2, %v280_v59, -inf }
  0x94   :  { %282 = vmax.xlane.f32.xlu1 %v281_v62  ;;  %v394_v0 = vsel %vm390_vm7, %v388_v55, %v392_v60  ;;  %v395_v1 = vsel %vm391_vm8, %v389_v56, %v393_v61  ;;  %529 = vmatpush3.bf16.msra.mxu1 %v186_v63 }
  0x95   :  { %v396_v2 = vadd.f32 %v512_v21, %v394_v0  ;;  %540 = vmatprep.subr.bf16.mxu1 %v618_v7  ;;  %v397_v4 = vadd.f32 %v513_v33, %v395_v1 }
  0x97   :  { %285 = vmax.xlane.f32.xlu0 %v284_v3  ;;  %v398_v5 = vsel %vm51_vm2, %v396_v2, -inf  ;;  %v401_v8 = vsel %vm51_vm2, %v397_v4, -inf }
  0x98   :  { %399 = vmax.xlane.f32.xlu1 %v398_v5 }
  0x9b   :  { %402 = vmax.xlane.f32.xlu0 %v401_v8 }
  0xa9   :  { %419 = vrot.lane.b32.xlu1 %v659_v6, %s619_s1 }
  0xb1   :  { %302 = vrot.lane.b32.xlu0 %v659_v6, %s621_s2 }
 0x117   :  { %v54_v9 = vpop.xlane.xlu1 %53 }
 0x118   :  { %v58_v10 = vsub.f32 %v672_v31, %v54_v9 }
 0x11a   :  { %v60_v11 = vmul.f32 1.442695, %v58_v10 }
 0x11b   :  { %v166_v12 = vpop.xlane.xlu1 %165 }
 0x11c   :  { %v170_v13 = vsub.f32 %v674_v32, %v166_v12  ;;  %v57_v14 = vpop.xlane.xlu0 %56  ;;  %565 = vpow2.f32 %v60_v11 }
 0x11d   :  { %v59_v15 = vsub.f32 %v50_v44, %v57_v14 }
 0x11e   :  { %v172_v16 = vmul.f32 1.442695, %v170_v13 }
 0x11f   :  { %v62_v17 = vmul.f32 1.442695, %v59_v15 }
 0x120   :  { %567 = vpow2.f32 %v172_v16  ;;  %v169_v18 = vpop.xlane.xlu0 %168 }
 0x121   :  { %569 = vpow2.f32 %v62_v17  ;;  %v171_v19 = vsub.f32 %v163_v47, %v169_v18  ;;  %v283_v20 = vpop.xlane.xlu1 %282 }
 0x122   :  { %v287_v21 = vsub.f32 %v279_v57, %v283_v20 }
 0x123   :  { %v174_v22 = vmul.f32 1.442695, %v171_v19 }
 0x124   :  { %v289_v6 = vmul.f32 1.442695, %v287_v21  ;;  %v286_v23 = vpop.xlane.xlu0 %285 }
 0x125   :  { %571 = vpow2.f32 %v174_v22  ;;  %v288_v24 = vsub.f32 %v280_v59, %v286_v23  ;;  %v400_v25 = vpop.xlane.xlu1 %399 }
 0x126   :  { %v404_v26 = vsub.f32 %v396_v2, %v400_v25  ;;  %573 = vpow2.f32 %v289_v6  ;;  %v566_v30 = vpop.eup %565 }
 0x127   :  { %v291_v27 = vmul.f32 1.442695, %v288_v24 }
 0x128   :  { %v406_v28 = vmul.f32 1.442695, %v404_v26  ;;  %v403_v29 = vpop.xlane.xlu0 %402 }
 0x129   :  { %575 = vpow2.f32 %v291_v27  ;;  %v405_v31 = vsub.f32 %v397_v4, %v403_v29  ;;  %v420_v39 = vpop.permute.xlu1 %419 }
 0x12a   :  { %v568_v32 = vpop.eup %567  ;;  %577 = vpow2.f32 %v406_v28 }
 0x12b   :  { %v570_v33 = vpop.eup %569  ;;  %v408_v34 = vmul.f32 1.442695, %v405_v31  ;;  %v176_v35 = vsel %vm51_vm2, %v568_v32, 0.0 }
 0x12c   :  { %177 = vadd.xlane.f32.xlu1 %v176_v35  ;;  %v303_v36 = vpop.permute.xlu0 %302  ;;  %v72_v37 = vpack.c.bf16 %v570_v33, %v566_v30  ;;  %v67_v52 = vsel %vm51_vm2, %v570_v33, 0.0 }
 0x12d   :  { %579 = vpow2.f32 %v408_v34 }
 0x12e   :  { %525 = vmatmul.mubr.msk.bf16.vlgmr.msra.gmra.mrb[0].mxu0 %vm51_vm2, %v72_v37 }
 0x12f   :  { %v572_v38 = vpop.eup %571  ;;  %535 = vmatpush3.bf16.msra.mxu0 %v303_v36  ;;  %536 = vmatprep.mubr.msk.bf16.mxu0 %vm620_vm9, %v618_v7 }
 0x130   :  { %v179_v40 = vsel %vm51_vm2, %v572_v38, 0.0  ;;  %v184_v41 = vpack.c.bf16 %v572_v38, %v568_v32  ;;  %v574_v42 = vpop.eup %573 }
 0x131   :  { %180 = vadd.xlane.f32.xlu0 %v179_v40  ;;  %v293_v44 = vsel %vm51_vm2, %v574_v42, 0.0 }
 0x132   :  { %531 = vmatmul.mubr.msk.bf16.vlgmr.msra.gmra.mrb[0].mxu1 %vm51_vm2, %v184_v41 }
 0x133   :  { %v576_v43 = vpop.eup %575  ;;  %541 = vmatpush3.bf16.msra.mxu1 %v420_v39  ;;  %542 = vmatprep.mubr.msk.bf16.mxu1 %vm620_vm9, %v618_v7  ;;  %v64_v7 = vsel %vm51_vm2, %v566_v30, 0.0 }
 0x134   :  { %v296_v45 = vsel %vm51_vm2, %v576_v43, 0.0  ;;  %v301_v46 = vpack.c.bf16 %v576_v43, %v574_v42  ;;  %v578_v47 = vpop.eup %577 }
 0x135   :  { %294 = vadd.xlane.f32.xlu0 %v293_v44  ;;  %297 = vadd.xlane.f32.xlu1 %v296_v45  ;;  %v410_v49 = vsel %vm51_vm2, %v578_v47, 0.0 }
 0x136   :  { %537 = vmatmul.mubr.msk.bf16.vlgmr.msra.gmra.mrb[4].mxu0 %vm51_vm2, %v301_v46 }
 0x137   :  { %v580_v48 = vpop.eup %579 }
 0x138   :  { %v413_v50 = vsel %vm51_vm2, %v580_v48, 0.0  ;;  %v418_v51 = vpack.c.bf16 %v580_v48, %v578_v47 }
 0x139   :  { %411 = vadd.xlane.f32.xlu0 %v410_v49  ;;  %414 = vadd.xlane.f32.xlu1 %v413_v50 }
 0x13a   :  { %543 = vmatmul.mubr.msk.bf16.vlgmr.msra.gmra.mrb[4].mxu1 %vm51_vm2, %v418_v51 }
 0x13d   :  { %65 = vadd.xlane.f32.xlu0 %v64_v7  ;;  %68 = vadd.xlane.f32.xlu1 %v67_v52 }
 0x1b9   :  { %v178_v54 = vpop.xlane.xlu1 %177 }
 0x1ba   :  { %v182_v63 = vmax.f32 %v178_v54, 1e-30 }
 0x1be   :  { %v181_v53 = vpop.xlane.xlu0 %180 }
 0x1bf   :  { %v183_v0 = vmax.f32 %v181_v53, 1e-30 }
 0x1c2   :  { %v295_v55 = vpop.xlane.xlu0 %294  ;;  %v298_v56 = vpop.xlane.xlu1 %297 }
 0x1c3   :  { %v299_v1 = vmax.f32 %v295_v55, 1e-30  ;;  %v300_v2 = vmax.f32 %v298_v56, 1e-30 }
 0x1c6   :  { %v412_v57 = vpop.xlane.xlu0 %411  ;;  %v415_v58 = vpop.xlane.xlu1 %414 }
 0x1c7   :  { %v416_v3 = vmax.f32 %v412_v57, 1e-30  ;;  %v417_v5 = vmax.f32 %v415_v58, 1e-30 }
 0x1ca   :  { %v66_v59 = vpop.xlane.xlu0 %65  ;;  %v69_v60 = vpop.xlane.xlu1 %68 }
 0x1cb   :  { %v70_v61 = vmax.f32 %v66_v59, 1e-30  ;;  %v71_v62 = vmax.f32 %v69_v60, 1e-30 }
 0x1cd   :  { %581 = vrcp.f32 %v70_v61 }
 0x1ce   :  { %583 = vrcp.f32 %v71_v62 }
 0x1cf   :  { %585 = vrcp.f32 %v182_v63 }
 0x1d0   :  { %587 = vrcp.f32 %v183_v0 }
 0x1d1   :  { %589 = vrcp.f32 %v299_v1 }
 0x1d2   :  { %591 = vrcp.f32 %v300_v2 }
 0x1d3   :  { %593 = vrcp.f32 %v416_v3 }
 0x1d4   :  { %595 = vrcp.f32 %v417_v5 }
 0x1d7   :  { %v582_v4 = vpop.eup %581 }
 0x1d8   :  { %v584_v11 = vpop.eup %583 }
 0x1d9   :  { %v586_v16 = vpop.eup %585 }
 0x1da   :  { %v588_v22 = vpop.eup %587 }
 0x1db   :  { %v590_v27 = vpop.eup %589 }
 0x1dc   :  { %v592_v33 = vpop.eup %591 }
 0x1dd   :  { %v594_v39 = vpop.eup %593 }
 0x1de   :  { %v596_v45 = vpop.eup %595 }
 0x201   :  { %v116_v8 = vpop.f32.mrb[0].mxu0 }
 0x202   :  { %v125_v9 = vmul.f32 %v582_v4, %v116_v8  ;;  %v526_v10 = vpop.f32.mrb[1].mxu0 }
 0x203   :  { %v119_v12 = vpop.f32.mrb[2].mxu0 }
 0x204   :  { %v129_v13 = vmin.f32 %v125_v9, 0.0  ;;  %v126_v14 = vmul.f32 %v584_v11, %v119_v12  ;;  %v527_v15 = vpop.f32.mrb[3].mxu0  ;;  %vm127_vm11 = vcmp.gt.f32.partialorder %v125_v9, 0.0 }
 0x205   :  { %v225_v17 = vpop.f32.mrb[0].mxu1 }
 0x206   :  { %v131_v18 = vmul.f32 1.442695, %v129_v13  ;;  %v130_v19 = vmin.f32 %v126_v14, 0.0  ;;  %v234_v20 = vmul.f32 %v586_v16, %v225_v17  ;;  %v532_v21 = vpop.f32.mrb[1].mxu1  ;;  %vm128_vm12 = vcmp.gt.f32.partialorder %v126_v14, 0.0 }
 0x207   :  { %v228_v6 = vpop.f32.mrb[2].mxu1 }
 0x208   :  { %597 = vpow2.f32 %v131_v18  ;;  %v133_v23 = vmul.f32 1.442695, %v130_v19  ;;  %v238_v24 = vmin.f32 %v234_v20, 0.0  ;;  %v235_v25 = vmul.f32 %v588_v22, %v228_v6  ;;  %v533_v26 = vpop.f32.mrb[3].mxu1 }
 0x209   :  { %v342_v28 = vpop.f32.mrb[4].mxu0  ;;  %vm236_vm13 = vcmp.gt.f32.partialorder %v234_v20, 0.0 }
 0x20a   :  { %599 = vpow2.f32 %v133_v23  ;;  %v240_v29 = vmul.f32 1.442695, %v238_v24  ;;  %v239_v30 = vmin.f32 %v235_v25, 0.0  ;;  %v351_v31 = vmul.f32 %v590_v27, %v342_v28  ;;  %v538_v32 = vpop.f32.mrb[5].mxu0 }
 0x20b   :  { %v345_v34 = vpop.f32.mrb[6].mxu0  ;;  %vm237_vm14 = vcmp.gt.f32.partialorder %v235_v25, 0.0 }
 0x20c   :  { %601 = vpow2.f32 %v240_v29  ;;  %v242_v35 = vmul.f32 1.442695, %v239_v30  ;;  %v355_v36 = vmin.f32 %v351_v31, 0.0  ;;  %v352_v37 = vmul.f32 %v592_v33, %v345_v34  ;;  %v539_v38 = vpop.f32.mrb[7].mxu0 }
 0x20d   :  { %v459_v40 = vpop.f32.mrb[4].mxu1  ;;  %vm353_vm0 = vcmp.gt.f32.partialorder %v351_v31, 0.0 }
 0x20e   :  { %603 = vpow2.f32 %v242_v35  ;;  %v357_v41 = vmul.f32 1.442695, %v355_v36  ;;  %v356_v42 = vmin.f32 %v352_v37, 0.0  ;;  %v468_v43 = vmul.f32 %v594_v39, %v459_v40  ;;  %v544_v44 = vpop.f32.mrb[5].mxu1 }
 0x20f   :  { %v462_v46 = vpop.f32.mrb[6].mxu1  ;;  %vm354_vm15 = vcmp.gt.f32.partialorder %v352_v37, 0.0 }
 0x210   :  { %605 = vpow2.f32 %v357_v41  ;;  %v359_v47 = vmul.f32 1.442695, %v356_v42  ;;  %v472_v48 = vmin.f32 %v468_v43, 0.0  ;;  %v469_v49 = vmul.f32 %v596_v45, %v462_v46  ;;  %v545_v50 = vpop.f32.mrb[7].mxu1 }
 0x211   :  { %vm470_vm2 = vcmp.gt.f32.partialorder %v468_v43, 0.0 }
 0x212   :  { %v598_v51 = vpop.eup %597  ;;  %607 = vpow2.f32 %v359_v47  ;;  %v474_v7 = vmul.f32 1.442695, %v472_v48  ;;  %v473_v52 = vmin.f32 %v469_v49, 0.0  ;;  %vm471_vm1 = vcmp.gt.f32.partialorder %v469_v49, 0.0 }
 0x213   :  { %v499_v53 = vadd.f32 -1.0, %v598_v51 }
 0x214   :  { %v600_v54 = vpop.eup %599  ;;  %609 = vpow2.f32 %v474_v7  ;;  %v476_v55 = vmul.f32 1.442695, %v473_v52 }
 0x215   :  { %v137_v56 = vsel %vm127_vm11, %v125_v9, %v499_v53  ;;  %v500_v57 = vadd.f32 -1.0, %v600_v54 }
 0x216   :  { %v602_v58 = vpop.eup %601  ;;  %140 = vst.msk [vmem:[%s739_s4] sm:$0xff] %vm139_vm10, %v137_v56  ;;  %611 = vpow2.f32 %v476_v55 }
 0x217   :  { %v138_v59 = vsel %vm128_vm12, %v126_v14, %v500_v57  ;;  %v502_v60 = vadd.f32 -1.0, %v602_v58 }
 0x218   :  { %v604_v61 = vpop.eup %603  ;;  %141 = vst.msk [vmem:[%s739_s4 + $0x8] sm:$0xff] %vm139_vm10, %v138_v59 }
 0x219   :  { %v246_v62 = vsel %vm236_vm13, %v234_v20, %v502_v60  ;;  %v503_v63 = vadd.f32 -1.0, %v604_v61 }
 0x21a   :  { %v606_v0 = vpop.eup %605  ;;  %250 = vrot.lane.b32.xlu0 %v246_v62, %s622_s28 }
 0x21b   :  { %v247_v1 = vsel %vm237_vm14, %v235_v25, %v503_v63  ;;  %v505_v2 = vadd.f32 -1.0, %v606_v0 }
 0x21c   :  { %v608_v3 = vpop.eup %607  ;;  %252 = vrot.lane.b32.xlu1 %v247_v1, %s622_s28 }
 0x21d   :  { %v506_v4 = vadd.f32 -1.0, %v608_v3  ;;  %v363_v9 = vsel %vm353_vm0, %v351_v31, %v505_v2 }
 0x21e   :  { %v610_v5 = vpop.eup %609 }
 0x21f   :  { %v364_v8 = vsel %vm354_vm15, %v352_v37, %v506_v4  ;;  %v508_v10 = vadd.f32 -1.0, %v610_v5 }
 0x220   :  { %v612_v11 = vpop.eup %611  ;;  %369 = vrot.lane.b32.xlu0 %v364_v8, %s623_s29  ;;  %367 = vrot.lane.b32.xlu1 %v363_v9, %s623_s29 }
 0x221   :  { %v509_v12 = vadd.f32 -1.0, %v612_v11  ;;  %v480_v14 = vsel %vm470_vm2, %v468_v43, %v508_v10 }
 0x223   :  { %v481_v13 = vsel %vm471_vm1, %v469_v49, %v509_v12 }
 0x224   :  { %486 = vrot.lane.b32.xlu0 %v481_v13, %s624_s30  ;;  %484 = vrot.lane.b32.xlu1 %v480_v14, %s624_s30 }
 0x28c   :  { %v251_v15 = vpop.permute.xlu0 %250 }
 0x28d   :  { %257 = vst.msk [vmem:[%s739_s4] sm:$0xff] %vm256_vm3, %v251_v15 }
 0x28e   :  { %v253_v16 = vpop.permute.xlu1 %252 }
 0x28f   :  { %258 = vst.msk [vmem:[%s739_s4 + $0x8] sm:$0xff] %vm256_vm3, %v253_v16 }
 0x292   :  { %v368_v17 = vpop.permute.xlu1 %367  ;;  %v370_v18 = vpop.permute.xlu0 %369 }
 0x293   :  { %374 = vst.msk [vmem:[%s739_s4] sm:$0xff] %vm373_vm4, %v368_v17  ;;  %375 = vst.msk [vmem:[%s739_s4 + $0x8] sm:$0xff] %vm373_vm4, %v370_v18 }
 0x296   :  { %v485_v19 = vpop.permute.xlu1 %484  ;;  %v487_v20 = vpop.permute.xlu0 %486 }
 0x297   :  { %491 = vst.msk [vmem:[%s739_s4] sm:$0xff] %vm490_vm5, %v485_v19  ;;  %492 = vst.msk [vmem:[%s739_s4 + $0x8] sm:$0xff] %vm490_vm5, %v487_v20 }

// kernel: net_forward.8
= control target key start
LH: loop header
LB: loop body
LE: loop exit
PB: predicated region body
PF: predicated region fallthrough
CT: control target
= control target key end

     0   :  { %v251_v0 = vmov 0.0   ;;  %vm252_vm0 = vmmov 0   ;;  %vm40_vm1 = vcmask 261120   ;;  %vm193_vm2 = vcmask 257024   ;;  %s337_s1 = inlined_call_operand.vmem [shape: bf16[32,32], index: 1, kind: input, shape index: {}]   ;;  %s338_s0 = inlined_call_operand.vmem [shape: f32[16,32], index: 0, kind: input, shape index: {}]   ;;  %s339_s2 = inlined_call_operand.vmem [shape: f32[32,4], index: 2, kind: input, shape index: {}]   ;;  %s340_s4 = inlined_call_operand.vmem [shape: bf16[16,32], index: 4, kind: output, shape index: {0}]   ;;  %s341_s3 = inlined_call_operand.vmem [shape: f32[4,32], index: 3, kind: input, shape index: {}]   ;;  %s342_s5 = inlined_call_operand.vmem [shape: f32[16,4], index: 5, kind: output, shape index: {1}]   ;;  %s343_s6 = inlined_call_operand.vmem [shape: f32[4,16], index: 6, kind: output, shape index: {2}]  }
   0x1   :  { %225 = vmatprep.subr.bf16.mxu0 %v251_v0  ;;  %v249_v1 = vld [vmem:[%s337_s1] sm:$0xff]   ;;  %229 = vmatprep.mubr.msk.bf16.mxu0 %vm252_vm0, %v251_v0  ;;  %v250_v2 = vld [vmem:[%s337_s1 + $0x8] sm:$0xff]   ;;  %v88_v9 = vld [vmem:[%s339_s2 + $0x10] sm:$0xff]  ;;  %vm136_vm3 = vcmask 31744   ;;  %vm184_vm4 = vcmask 125952  }
   0x2   :  { %233 = vmatprep.subr.bf16.mxu1 %v251_v0  ;;  %237 = vmatprep.mubr.msk.bf16.mxu1 %vm252_vm0, %v251_v0  ;;  %v21_v3 = vld [vmem:[%s338_s0] sm:$0xff]  ;;  %v22_v4 = vld [vmem:[%s338_s0 + $0x8] sm:$0xff]  ;;  %v89_v10 = vld [vmem:[%s339_s2 + $0x18] sm:$0xff] }
   0x3   :  { %226 = vmatpush3.bf16.msra.mxu0 %v249_v1  ;;  %v86_v5 = vld [vmem:[%s339_s2] sm:$0xff]  ;;  %v87_v6 = vld [vmem:[%s339_s2 + $0x8] sm:$0xff]  ;;  %v23_v8 = vpack.c.bf16 %v22_v4, %v21_v3  ;;  %v91_v11 = vpack.c.bf16 %v89_v10, %v88_v9 }
   0x4   :  { %227 = vmatprep.subr.bf16.mxu0 %v251_v0  ;;  %v90_v7 = vpack.c.bf16 %v87_v6, %v86_v5  ;;  %v139_v20 = vld [vmem:[%s341_s3] sm:$0xf] }
   0x5   :  { %v140_v21 = vpack.c.bf16 %v139_v20, %v139_v20 }
   0x6   :  { %234 = vmatpush3.bf16.msra.mxu1 %v90_v7 }
   0x7   :  { %228 = vmatpush3.bf16.msra.mxu0 %v250_v2  ;;  %235 = vmatprep.subr.bf16.mxu1 %v251_v0 }
   0x8   :  { %241 = vmatprep.subr.bf16.mxu0 %v251_v0 }
   0xa   :  { %230 = vmatmul.mubr.msk.bf16.vlgmr.msra.gmra.mrb[0].mxu0 %vm40_vm1, %v23_v8  ;;  %236 = vmatpush3.bf16.msra.mxu1 %v91_v11 }
   0xb   :  { %243 = vmatprep.mubr.msk.bf16.mxu0 %vm252_vm0, %v251_v0 }
  0xdd   :  { %v78_v12 = vpop.f32.mrb[0].mxu0 }
  0xde   :  { %v215_v13 = vpack.c.bf16 %v78_v12, %v78_v12  ;;  %v231_v14 = vpop.f32.mrb[1].mxu0 }
  0xdf   :  { %v81_v15 = vpop.f32.mrb[2].mxu0 }
  0xe0   :  { %194 = vst.msk [vmem:[%s340_s4] sm:$0xf] %vm193_vm2, %v215_v13  ;;  %v85_v16 = vpack.c.bf16 %v81_v15, %v78_v12  ;;  %v216_v17 = vpack.c.bf16 %v81_v15, %v81_v15  ;;  %v232_v18 = vpop.f32.mrb[3].mxu0 }
  0xe2   :  { %195 = vst.msk [vmem:[%s340_s4 + $0x4] sm:$0xf] %vm193_vm2, %v216_v17  ;;  %238 = vmatmul.mubr.msk.bf16.vlgmr.msra.gmra.mrb[0].mxu1 %vm40_vm1, %v85_v16  ;;  %v93_v19 = vsel %vm40_vm1, %v85_v16, 0 }
  0xe3   :  { %242 = vmatpush3.bf16.xpose.msra.mxu0 %v93_v19 }
  0xea   :  { %244 = vmatmul.mubr.msk.bf16.vlgmr.msra.gmra.mrb[4].mxu0 %vm40_vm1, %v140_v21 }
 0x1b5   :  { %v129_v22 = vpop.f32.mrb[0].mxu1 }
 0x1b6   :  { %137 = vst.msk [vmem:[%s342_s5] sm:$0xff] %vm136_vm3, %v129_v22  ;;  %v239_v23 = vpop.f32.mrb[1].mxu1 }
 0x1b7   :  { %v132_v24 = vpop.f32.mrb[2].mxu1 }
 0x1b8   :  { %138 = vst.msk [vmem:[%s342_s5 + $0x8] sm:$0xff] %vm136_vm3, %v132_v24  ;;  %v240_v25 = vpop.f32.mrb[3].mxu1 }
 0x1bd   :  { %v178_v26 = vpop.f32.mrb[4].mxu0 }
 0x1be   :  { %185 = vst.msk [vmem:[%s343_s6] sm:$0xf] %vm184_vm4, %v178_v26  ;;  %v245_v27 = vpop.f32.mrb[5].mxu0 }
 0x1bf   :  { %v181_v28 = vpop.f32.mrb[6].mxu0 }
 0x1c0   :  { %v246_v29 = vpop.f32.mrb[7].mxu0 }

// kernel: net_forward.9
= control target key start
LH: loop header
LB: loop body
LE: loop exit
PB: predicated region body
PF: predicated region fallthrough
CT: control target
= control target key end

     0   :  { %v549_v0 = vmov 1   ;;  %v550_v1 = vmov 0   ;;  %v551_v4 = vmov 2   ;;  %v552_v5 = vmov 3   ;;  %s553_s21 = smov 120   ;;  %s558_s28 = smov 8   ;;  %s671_s0 = inlined_call_operand.vmem [shape: f32[16,4], index: 0, kind: input, shape index: {}]   ;;  %s672_s3 = inlined_call_operand.vmem [shape: bf16[16,32], index: 3, kind: input, shape index: {}]   ;;  %s673_s1 = inlined_call_operand.vmem [shape: f32[4,16], index: 1, kind: input, shape index: {}]   ;;  %s674_s2 = inlined_call_operand.vmem [shape: bf16[16,16], index: 2, kind: input, shape index: {}]   ;;  %s675_s4 = inlined_call_operand.vmem [shape: f32[16,32], index: 4, kind: output, shape index: {}]  }
   0x1   :  { %511 = vset.pattern.permute.xlu1 %v549_v0  ;;  %510 = vset.pattern.permute.xlu0 %v550_v1  ;;  %v22_v2 = vld [vmem:[%s671_s0] sm:$0xff]  ;;  %v23_v3 = vld [vmem:[%s671_s0 + $0x8] sm:$0xff]  ;;  %v554_v7 = vmov 0.0   ;;  %v37_v8 = vlaneseq  ;;  %vm51_vm2 = vcmask 130048   ;;  %vm556_vm9 = vmmov 0   ;;  %s559_s29 = smov 16  }
   0x2   :  { %133 = vperm.xlu1 %511, %v22_v2   ;;  %29 = vperm.xlu0 %510, %v22_v2   ;;  %v595_v6 = vld [vmem:[%s672_s3] sm:$0xff]   ;;  %vm129_vm10 = vcmask 64512   ;;  %s560_s30 = smov 24   ;;  %vm236_vm11 = vcmask 130112   ;;  %vm343_vm12 = vcmask 195712   ;;  %vm450_vm13 = vcmask 261312  }
   0x3   :  { %480 = vmatprep.subr.bf16.mxu1 %v554_v7  ;;  %474 = vmatprep.subr.bf16.mxu0 %v554_v7  ;;  %v38_v9 = vshrl.u32 %v37_v8, 7  ;;  %v24_v12 = vld [vmem:[%s673_s1] sm:$0xf]  ;;  %s555_s1 = smov 104  }
   0x4   :  { %475 = vmatpush3.bf16.msra.mxu0 %v595_v6  ;;  %v463_v15 = vld [vmem:[%s674_s2] sm:$0xff]   ;;  %476 = vmatprep.mubr.msk.bf16.mxu0 %vm556_vm9, %v554_v7  ;;  %s557_s2 = smov 112  }
   0x5   :  { %486 = vmatprep.subr.bf16.mxu0 %v554_v7  ;;  %v142_v10 = vsub.s32 1, %v38_v9  ;;  %v39_v11 = vsub.s32 0, %v38_v9  ;;  %v249_v18 = vsub.s32 2, %v38_v9  ;;  %v464_v21 = vunpack.c.l.bf16 %v463_v15  ;;  %482 = vmatprep.mubr.msk.bf16.mxu1 %vm556_vm9, %v554_v7 }
   0x6   :  { %137 = vperm.xlu1 %511, %v23_v3   ;;  %34 = vperm.xlu0 %510, %v23_v3   ;;  %v465_v33 = vunpack.c.h.bf16 %v463_v15  ;;  %v356_v34 = vsub.s32 3, %v38_v9 }
   0x7   :  { %v143_v13 = vrot.slane %v24_v12, %v142_v10  ;;  %v40_v14 = vrot.slane %v24_v12, %v39_v11  ;;  %v250_v26 = vrot.slane %v24_v12, %v249_v18 }
   0x8   :  { %v357_v46 = vrot.slane %v24_v12, %v356_v34 }
   0xa   :  { %513 = vset.pattern.permute.xlu1 %v551_v4  ;;  %512 = vset.pattern.permute.xlu0 %v551_v4 }
   0xb   :  { %244 = vperm.xlu1 %513, %v23_v3   ;;  %240 = vperm.xlu0 %512, %v22_v2  }
   0xf   :  { %514 = vset.pattern.permute.xlu1 %v552_v5  ;;  %515 = vset.pattern.permute.xlu0 %v552_v5 }
  0x10   :  { %347 = vperm.xlu1 %514, %v22_v2   ;;  %351 = vperm.xlu0 %515, %v23_v3  }
  0x14   :  { %175 = vrot.lane.b32.xlu1 %v595_v6, %s553_s21 }
  0x81   :  { %v134_v16 = vpop.permute.xlu1 %133  ;;  %v30_v17 = vpop.permute.xlu0 %29 }
  0x82   :  { %v144_v19 = vadd.f32 %v143_v13, %v134_v16  ;;  %v41_v20 = vadd.f32 %v40_v14, %v30_v17 }
  0x84   :  { %vm146_vm0 = vcmp.gt.f32.partialorder %v144_v19, 0.0  ;;  %v148_v22 = vmul.f32 0.2, %v144_v19  ;;  %vm43_vm1 = vcmp.gt.f32.partialorder %v41_v20, 0.0  ;;  %v45_v23 = vmul.f32 0.2, %v41_v20 }
  0x85   :  { %v138_v24 = vpop.permute.xlu1 %137  ;;  %v35_v25 = vpop.permute.xlu0 %34 }
  0x86   :  { %v145_v27 = vadd.f32 %v143_v13, %v138_v24  ;;  %v42_v28 = vadd.f32 %v40_v14, %v35_v25  ;;  %v47_v29 = vsel %vm43_vm1, %v41_v20, %v45_v23  ;;  %v150_v30 = vsel %vm146_vm0, %v144_v19, %v148_v22 }
  0x87   :  { %v608_v31 = vadd.f32 %v464_v21, %v47_v29  ;;  %v610_v32 = vadd.f32 %v464_v21, %v150_v30 }
  0x88   :  { %vm147_vm3 = vcmp.gt.f32.partialorder %v145_v27, 0.0  ;;  %v149_v35 = vmul.f32 0.2, %v145_v27  ;;  %vm44_vm4 = vcmp.gt.f32.partialorder %v42_v28, 0.0  ;;  %v46_v36 = vmul.f32 0.2, %v42_v28 }
  0x89   :  { %v52_v37 = vsel %vm51_vm2, %v608_v31, -inf  ;;  %v154_v45 = vsel %vm51_vm2, %v610_v32, -inf }
  0x8a   :  { %v245_v38 = vpop.permute.xlu1 %244  ;;  %53 = vmax.xlane.f32.xlu1 %v52_v37  ;;  %v241_v39 = vpop.permute.xlu0 %240  ;;  %v48_v40 = vsel %vm44_vm4, %v42_v28, %v46_v36  ;;  %v151_v41 = vsel %vm147_vm3, %v145_v27, %v149_v35 }
  0x8b   :  { %v252_v42 = vadd.f32 %v250_v26, %v245_v38  ;;  %v251_v43 = vadd.f32 %v250_v26, %v241_v39  ;;  %v50_v44 = vadd.f32 %v465_v33, %v48_v40  ;;  %v153_v47 = vadd.f32 %v465_v33, %v151_v41 }
  0x8d   :  { %vm254_vm5 = vcmp.gt.f32.partialorder %v252_v42, 0.0  ;;  %v256_v48 = vmul.f32 0.2, %v252_v42  ;;  %vm253_vm6 = vcmp.gt.f32.partialorder %v251_v43, 0.0  ;;  %v255_v49 = vmul.f32 0.2, %v251_v43 }
  0x8e   :  { %155 = vmax.xlane.f32.xlu1 %v154_v45  ;;  %v55_v50 = vsel %vm51_vm2, %v50_v44, -inf  ;;  %v157_v58 = vsel %vm51_vm2, %v153_v47, -inf }
  0x8f   :  { %56 = vmax.xlane.f32.xlu0 %v55_v50  ;;  %v348_v51 = vpop.permute.xlu1 %347  ;;  %v352_v52 = vpop.permute.xlu0 %351  ;;  %v257_v53 = vsel %vm253_vm6, %v251_v43, %v255_v49  ;;  %v258_v54 = vsel %vm254_vm5, %v252_v42, %v256_v48 }
  0x90   :  { %v358_v55 = vadd.f32 %v357_v46, %v348_v51  ;;  %v359_v56 = vadd.f32 %v357_v46, %v352_v52  ;;  %v259_v57 = vadd.f32 %v464_v21, %v257_v53  ;;  %v260_v59 = vadd.f32 %v465_v33, %v258_v54 }
  0x92   :  { %vm360_vm7 = vcmp.gt.f32.partialorder %v358_v55, 0.0  ;;  %v362_v60 = vmul.f32 0.2, %v358_v55  ;;  %vm361_vm8 = vcmp.gt.f32.partialorder %v359_v56, 0.0  ;;  %v363_v61 = vmul.f32 0.2, %v359_v56 }
  0x93   :  { %158 = vmax.xlane.f32.xlu0 %v157_v58  ;;  %v261_v62 = vsel %vm51_vm2, %v259_v57, -inf  ;;  %v176_v63 = vpop.permute.xlu1 %175  ;;  %v264_v3 = vsel %vm51_vm2, %v260_v59, -inf }
  0x94   :  { %262 = vmax.xlane.f32.xlu1 %v261_v62  ;;  %v364_v0 = vsel %vm360_vm7, %v358_v55, %v362_v60  ;;  %v365_v1 = vsel %vm361_vm8, %v359_v56, %v363_v61  ;;  %481 = vmatpush3.bf16.msra.mxu1 %v176_v63 }
  0x95   :  { %v366_v2 = vadd.f32 %v464_v21, %v364_v0  ;;  %492 = vmatprep.subr.bf16.mxu1 %v554_v7  ;;  %v367_v4 = vadd.f32 %v465_v33, %v365_v1 }
  0x97   :  { %265 = vmax.xlane.f32.xlu0 %v264_v3  ;;  %v368_v5 = vsel %vm51_vm2, %v366_v2, -inf  ;;  %v371_v8 = vsel %vm51_vm2, %v367_v4, -inf }
  0x98   :  { %369 = vmax.xlane.f32.xlu1 %v368_v5 }
  0x9b   :  { %372 = vmax.xlane.f32.xlu0 %v371_v8 }
  0xa9   :  { %389 = vrot.lane.b32.xlu1 %v595_v6, %s555_s1 }
  0xb1   :  { %282 = vrot.lane.b32.xlu0 %v595_v6, %s557_s2 }
 0x117   :  { %v54_v9 = vpop.xlane.xlu1 %53 }
 0x118   :  { %v58_v10 = vsub.f32 %v608_v31, %v54_v9 }
 0x11a   :  { %v60_v11 = vmul.f32 1.442695, %v58_v10 }
 0x11b   :  { %v156_v12 = vpop.xlane.xlu1 %155 }
 0x11c   :  { %v160_v13 = vsub.f32 %v610_v32, %v156_v12  ;;  %v57_v14 = vpop.xlane.xlu0 %56  ;;  %517 = vpow2.f32 %v60_v11 }
 0x11d   :  { %v59_v15 = vsub.f32 %v50_v44, %v57_v14 }
 0x11e   :  { %v162_v16 = vmul.f32 1.442695, %v160_v13 }
 0x11f   :  { %v62_v17 = vmul.f32 1.442695, %v59_v15 }
 0x120   :  { %519 = vpow2.f32 %v162_v16  ;;  %v159_v18 = vpop.xlane.xlu0 %158 }
 0x121   :  { %521 = vpow2.f32 %v62_v17  ;;  %v161_v19 = vsub.f32 %v153_v47, %v159_v18  ;;  %v263_v20 = vpop.xlane.xlu1 %262 }
 0x122   :  { %v267_v21 = vsub.f32 %v259_v57, %v263_v20 }
 0x123   :  { %v164_v22 = vmul.f32 1.442695, %v161_v19 }
 0x124   :  { %v269_v6 = vmul.f32 1.442695, %v267_v21  ;;  %v266_v23 = vpop.xlane.xlu0 %265 }
 0x125   :  { %523 = vpow2.f32 %v164_v22  ;;  %v268_v24 = vsub.f32 %v260_v59, %v266_v23  ;;  %v370_v25 = vpop.xlane.xlu1 %369 }
 0x126   :  { %v374_v26 = vsub.f32 %v366_v2, %v370_v25  ;;  %525 = vpow2.f32 %v269_v6  ;;  %v518_v30 = vpop.eup %517 }
 0x127   :  { %v271_v27 = vmul.f32 1.442695, %v268_v24 }
 0x128   :  { %v376_v28 = vmul.f32 1.442695, %v374_v26  ;;  %v373_v29 = vpop.xlane.xlu0 %372 }
 0x129   :  { %527 = vpow2.f32 %v271_v27  ;;  %v375_v31 = vsub.f32 %v367_v4, %v373_v29  ;;  %v390_v39 = vpop.permute.xlu1 %389 }
 0x12a   :  { %v520_v32 = vpop.eup %519  ;;  %529 = vpow2.f32 %v376_v28 }
 0x12b   :  { %v522_v33 = vpop.eup %521  ;;  %v378_v34 = vmul.f32 1.442695, %v375_v31  ;;  %v166_v35 = vsel %vm51_vm2, %v520_v32, 0.0 }
 0x12c   :  { %167 = vadd.xlane.f32.xlu1 %v166_v35  ;;  %v283_v36 = vpop.permute.xlu0 %282  ;;  %v72_v37 = vpack.c.bf16 %v522_v33, %v518_v30  ;;  %v67_v52 = vsel %vm51_vm2, %v522_v33, 0.0 }
 0x12d   :  { %531 = vpow2.f32 %v378_v34 }
 0x12e   :  { %477 = vmatmul.mubr.msk.bf16.vlgmr.msra.gmra.mrb[0].mxu0 %vm51_vm2, %v72_v37 }
 0x12f   :  { %v524_v38 = vpop.eup %523  ;;  %487 = vmatpush3.bf16.msra.mxu0 %v283_v36  ;;  %488 = vmatprep.mubr.msk.bf16.mxu0 %vm556_vm9, %v554_v7 }
 0x130   :  { %v169_v40 = vsel %vm51_vm2, %v524_v38, 0.0  ;;  %v174_v41 = vpack.c.bf16 %v524_v38, %v520_v32  ;;  %v526_v42 = vpop.eup %525 }
 0x131   :  { %170 = vadd.xlane.f32.xlu0 %v169_v40  ;;  %v273_v44 = vsel %vm51_vm2, %v526_v42, 0.0 }
 0x132   :  { %483 = vmatmul.mubr.msk.bf16.vlgmr.msra.gmra.mrb[0].mxu1 %vm51_vm2, %v174_v41 }
 0x133   :  { %v528_v43 = vpop.eup %527  ;;  %493 = vmatpush3.bf16.msra.mxu1 %v390_v39  ;;  %494 = vmatprep.mubr.msk.bf16.mxu1 %vm556_vm9, %v554_v7  ;;  %v64_v7 = vsel %vm51_vm2, %v518_v30, 0.0 }
 0x134   :  { %v276_v45 = vsel %vm51_vm2, %v528_v43, 0.0  ;;  %v281_v46 = vpack.c.bf16 %v528_v43, %v526_v42  ;;  %v530_v47 = vpop.eup %529 }
 0x135   :  { %274 = vadd.xlane.f32.xlu0 %v273_v44  ;;  %277 = vadd.xlane.f32.xlu1 %v276_v45  ;;  %v380_v49 = vsel %vm51_vm2, %v530_v47, 0.0 }
 0x136   :  { %489 = vmatmul.mubr.msk.bf16.vlgmr.msra.gmra.mrb[4].mxu0 %vm51_vm2, %v281_v46 }
 0x137   :  { %v532_v48 = vpop.eup %531 }
 0x138   :  { %v383_v50 = vsel %vm51_vm2, %v532_v48, 0.0  ;;  %v388_v51 = vpack.c.bf16 %v532_v48, %v530_v47 }
 0x139   :  { %381 = vadd.xlane.f32.xlu0 %v380_v49  ;;  %384 = vadd.xlane.f32.xlu1 %v383_v50 }
 0x13a   :  { %495 = vmatmul.mubr.msk.bf16.vlgmr.msra.gmra.mrb[4].mxu1 %vm51_vm2, %v388_v51 }
 0x13d   :  { %65 = vadd.xlane.f32.xlu0 %v64_v7  ;;  %68 = vadd.xlane.f32.xlu1 %v67_v52 }
 0x1b9   :  { %v168_v54 = vpop.xlane.xlu1 %167 }
 0x1ba   :  { %v172_v63 = vmax.f32 %v168_v54, 1e-30 }
 0x1be   :  { %v171_v53 = vpop.xlane.xlu0 %170 }
 0x1bf   :  { %v173_v0 = vmax.f32 %v171_v53, 1e-30 }
 0x1c2   :  { %v275_v55 = vpop.xlane.xlu0 %274  ;;  %v278_v56 = vpop.xlane.xlu1 %277 }
 0x1c3   :  { %v279_v1 = vmax.f32 %v275_v55, 1e-30  ;;  %v280_v2 = vmax.f32 %v278_v56, 1e-30 }
 0x1c6   :  { %v382_v57 = vpop.xlane.xlu0 %381  ;;  %v385_v58 = vpop.xlane.xlu1 %384 }
 0x1c7   :  { %v386_v3 = vmax.f32 %v382_v57, 1e-30  ;;  %v387_v5 = vmax.f32 %v385_v58, 1e-30 }
 0x1ca   :  { %v66_v59 = vpop.xlane.xlu0 %65  ;;  %v69_v60 = vpop.xlane.xlu1 %68 }
 0x1cb   :  { %v70_v61 = vmax.f32 %v66_v59, 1e-30  ;;  %v71_v62 = vmax.f32 %v69_v60, 1e-30 }
 0x1cd   :  { %533 = vrcp.f32 %v70_v61 }
 0x1ce   :  { %535 = vrcp.f32 %v71_v62 }
 0x1cf   :  { %537 = vrcp.f32 %v172_v63 }
 0x1d0   :  { %539 = vrcp.f32 %v173_v0 }
 0x1d1   :  { %541 = vrcp.f32 %v279_v1 }
 0x1d2   :  { %543 = vrcp.f32 %v280_v2 }
 0x1d3   :  { %545 = vrcp.f32 %v386_v3 }
 0x1d4   :  { %547 = vrcp.f32 %v387_v5 }
 0x1d7   :  { %v534_v4 = vpop.eup %533 }
 0x1d8   :  { %v536_v11 = vpop.eup %535 }
 0x1d9   :  { %v538_v16 = vpop.eup %537 }
 0x1da   :  { %v540_v21 = vpop.eup %539 }
 0x1db   :  { %v542_v25 = vpop.eup %541 }
 0x1dc   :  { %v544_v30 = vpop.eup %543 }
 0x1dd   :  { %v546_v34 = vpop.eup %545 }
 0x1de   :  { %v548_v40 = vpop.eup %547 }
 0x201   :  { %v116_v8 = vpop.f32.mrb[0].mxu0 }
 0x202   :  { %v125_v9 = vmul.f32 %v534_v4, %v116_v8  ;;  %v478_v10 = vpop.f32.mrb[1].mxu0 }
 0x203   :  { %v119_v12 = vpop.f32.mrb[2].mxu0 }
 0x204   :  { %v127_v13 = vmax.f32 %v125_v9, 0.0  ;;  %v126_v14 = vmul.f32 %v536_v11, %v119_v12  ;;  %v479_v15 = vpop.f32.mrb[3].mxu0 }
 0x205   :  { %v215_v17 = vpop.f32.mrb[0].mxu1 }
 0x206   :  { %130 = vst.msk [vmem:[%s675_s4] sm:$0xff] %vm129_vm10, %v127_v13  ;;  %v128_v18 = vmax.f32 %v126_v14, 0.0  ;;  %v224_v19 = vmul.f32 %v538_v16, %v215_v17  ;;  %v484_v20 = vpop.f32.mrb[1].mxu1 }
 0x207   :  { %v218_v22 = vpop.f32.mrb[2].mxu1 }
 0x208   :  { %131 = vst.msk [vmem:[%s675_s4 + $0x8] sm:$0xff] %vm129_vm10, %v128_v18  ;;  %v226_v6 = vmax.f32 %v224_v19, 0.0  ;;  %v225_v23 = vmul.f32 %v540_v21, %v218_v22  ;;  %v485_v24 = vpop.f32.mrb[3].mxu1 }
 0x209   :  { %v322_v26 = vpop.f32.mrb[4].mxu0 }
 0x20a   :  { %v227_v27 = vmax.f32 %v225_v23, 0.0  ;;  %v331_v28 = vmul.f32 %v542_v25, %v322_v26  ;;  %230 = vrot.lane.b32.xlu0 %v226_v6, %s558_s28  ;;  %v490_v29 = vpop.f32.mrb[5].mxu0 }
 0x20b   :  { %v325_v31 = vpop.f32.mrb[6].mxu0 }
 0x20c   :  { %v332_v32 = vmul.f32 %v544_v30, %v325_v31  ;;  %v491_v33 = vpop.f32.mrb[7].mxu0  ;;  %232 = vrot.lane.b32.xlu1 %v227_v27, %s558_s28  ;;  %v333_v36 = vmax.f32 %v331_v28, 0.0 }
 0x20d   :  { %v429_v35 = vpop.f32.mrb[4].mxu1 }
 0x20e   :  { %v334_v37 = vmax.f32 %v332_v32, 0.0  ;;  %v438_v38 = vmul.f32 %v546_v34, %v429_v35  ;;  %v496_v39 = vpop.f32.mrb[5].mxu1 }
 0x20f   :  { %v432_v41 = vpop.f32.mrb[6].mxu1 }
 0x210   :  { %v439_v42 = vmul.f32 %v548_v40, %v432_v41  ;;  %v497_v43 = vpop.f32.mrb[7].mxu1  ;;  %339 = vrot.lane.b32.xlu0 %v334_v37, %s559_s29  ;;  %337 = vrot.lane.b32.xlu1 %v333_v36, %s559_s29  ;;  %v440_v44 = vmax.f32 %v438_v38, 0.0 }
 0x212   :  { %v441_v45 = vmax.f32 %v439_v42, 0.0 }
 0x214   :  { %446 = vrot.lane.b32.xlu0 %v441_v45, %s560_s30  ;;  %444 = vrot.lane.b32.xlu1 %v440_v44, %s560_s30 }
 0x27c   :  { %v231_v46 = vpop.permute.xlu0 %230 }
 0x27d   :  { %237 = vst.msk [vmem:[%s675_s4] sm:$0xff] %vm236_vm11, %v231_v46 }
 0x27e   :  { %v233_v47 = vpop.permute.xlu1 %232 }
 0x27f   :  { %238 = vst.msk [vmem:[%s675_s4 + $0x8] sm:$0xff] %vm236_vm11, %v233_v47 }
 0x282   :  { %v338_v48 = vpop.permute.xlu1 %337  ;;  %v340_v49 = vpop.permute.xlu0 %339 }
 0x283   :  { %344 = vst.msk [vmem:[%s675_s4] sm:$0xff] %vm343_vm12, %v338_v48  ;;  %345 = vst.msk [vmem:[%s675_s4 + $0x8] sm:$0xff] %vm343_vm12, %v340_v49 }
 0x286   :  { %v445_v50 = vpop.permute.xlu1 %444  ;;  %v447_v51 = vpop.permute.xlu0 %446 }
 0x287   :  { %451 = vst.msk [vmem:[%s675_s4] sm:$0xff] %vm450_vm13, %v445_v50  ;;  %452 = vst.msk [vmem:[%s675_s4 + $0x8] sm:$0xff] %vm450_vm13, %v447_v51 }

// kernel: net_forward.11
= control target key start
LH: loop header
LB: loop body
LE: loop exit
PB: predicated region body
PF: predicated region fallthrough
CT: control target
= control target key end

     0   :  { %v200_v0 = vmov 0   ;;  %vm53_vm1 = vcmask 130048   ;;  %v201_v20 = vmov 0.0   ;;  %vm202_vm3 = vmmov 0   ;;  %s274_s0 = inlined_call_operand.vmem [shape: f32[16,1], index: 0, kind: input, shape index: {}]   ;;  %s275_s1 = inlined_call_operand.vmem [shape: f32[1,16], index: 1, kind: input, shape index: {}]   ;;  %s276_s2 = inlined_call_operand.vmem [shape: bf16[16,16], index: 2, kind: input, shape index: {}]   ;;  %s277_s3 = inlined_call_operand.vmem [shape: bf16[16,8], index: 3, kind: input, shape index: {}]   ;;  %s278_s4 = inlined_call_operand.vmem [shape: f32[16,8], index: 4, kind: output, shape index: {}]  }
   0x1   :  { %182 = vset.pattern.permute.xlu0 %v200_v0  ;;  %v22_v1 = vld [vmem:[%s274_s0] sm:$0xff]  ;;  %v23_v2 = vld [vmem:[%s274_s0 + $0x8] sm:$0xff]  ;;  %173 = vmatprep.subr.bf16.mxu0 %v201_v20  ;;  %vm129_vm4 = vcmask 64512  }
   0x2   :  { %29 = vperm.xlu0 %182, %v22_v1   ;;  %v164_v3 = vld [vmem:[%s275_s1] ss:$0 sm:$0xff]  ;;  %175 = vmatprep.mubr.msk.bf16.mxu0 %vm202_vm3, %v201_v20 }
   0x3   :  { %v168_v4 = vld [vmem:[%s276_s2] sm:$0xff]  }
   0x4   :  { %v169_v7 = vunpack.c.l.bf16 %v168_v4  ;;  %v170_v13 = vunpack.c.h.bf16 %v168_v4  ;;  %v183_v19 = vld [vmem:[%s277_s3] sm:$0xff]  }
   0x5   :  { %174 = vmatpush3.bf16.msra.mxu0 %v183_v19 }
   0x6   :  { %34 = vperm.xlu0 %182, %v23_v2  }
  0x81   :  { %v30_v5 = vpop.permute.xlu0 %29 }
  0x82   :  { %v43_v6 = vadd.f32 %v164_v3, %v30_v5 }
  0x84   :  { %v47_v8 = vmul.f32 0.2, %v43_v6  ;;  %vm45_vm0 = vcmp.gt.f32.partialorder %v43_v6, 0.0 }
  0x85   :  { %v35_v9 = vpop.permute.xlu0 %34 }
  0x86   :  { %v44_v10 = vadd.f32 %v164_v3, %v35_v9  ;;  %v49_v11 = vsel %vm45_vm0, %v43_v6, %v47_v8 }
  0x87   :  { %v51_v12 = vadd.f32 %v169_v7, %v49_v11 }
  0x88   :  { %vm46_vm2 = vcmp.gt.f32.partialorder %v44_v10, 0.0  ;;  %v48_v14 = vmul.f32 0.2, %v44_v10 }
  0x89   :  { %v54_v15 = vsel %vm53_vm1, %v51_v12, -inf }
  0x8a   :  { %55 = vmax.xlane.f32.xlu1 %v54_v15  ;;  %v50_v16 = vsel %vm46_vm2, %v44_v10, %v48_v14 }
  0x8b   :  { %v52_v17 = vadd.f32 %v170_v13, %v50_v16 }
  0x8d   :  { %v57_v18 = vsel %vm53_vm1, %v52_v17, -inf }
  0x8e   :  { %58 = vmax.xlane.f32.xlu1 %v57_v18 }
 0x117   :  { %v56_v21 = vpop.xlane.xlu1 %55 }
 0x118   :  { %v60_v22 = vsub.f32 %v51_v12, %v56_v21 }
 0x11a   :  { %v62_v23 = vmul.f32 1.442695, %v60_v22 }
 0x11b   :  { %v59_v24 = vpop.xlane.xlu1 %58 }
 0x11c   :  { %184 = vpow2.f32 %v62_v23  ;;  %v61_v25 = vsub.f32 %v52_v17, %v59_v24 }
 0x11e   :  { %v64_v26 = vmul.f32 1.442695, %v61_v25 }
 0x120   :  { %186 = vpow2.f32 %v64_v26 }
 0x126   :  { %v185_v27 = vpop.eup %184 }
 0x127   :  { %v66_v28 = vsel %vm53_vm1, %v185_v27, 0.0 }
 0x128   :  { %67 = vadd.xlane.f32.xlu0 %v66_v28 }
 0x12a   :  { %v187_v29 = vpop.eup %186 }
 0x12b   :  { %v69_v30 = vsel %vm53_vm1, %v187_v29, 0.0  ;;  %v74_v31 = vpack.c.bf16 %v187_v29, %v185_v27 }
 0x12c   :  { %70 = vadd.xlane.f32.xlu1 %v69_v30 }
 0x12d   :  { %176 = vmatmul.mubr.msk.bf16.vlgmr.msra.gmra.mrb[0].mxu0 %vm53_vm1, %v74_v31 }
 0x1b5   :  { %v68_v32 = vpop.xlane.xlu0 %67 }
 0x1b6   :  { %v72_v34 = vmax.f32 %v68_v32, 1e-30 }
 0x1b8   :  { %188 = vrcp.f32 %v72_v34 }
 0x1b9   :  { %v71_v33 = vpop.xlane.xlu1 %70 }
 0x1ba   :  { %v73_v35 = vmax.f32 %v71_v33, 1e-30 }
 0x1bc   :  { %190 = vrcp.f32 %v73_v35 }
 0x1c2   :  { %v189_v36 = vpop.eup %188 }
 0x1c6   :  { %v191_v40 = vpop.eup %190 }
 0x200   :  { %v118_v37 = vpop.f32.mrb[0].mxu0 }
 0x201   :  { %v127_v38 = vmul.f32 %v189_v36, %v118_v37  ;;  %v177_v39 = vpop.f32.mrb[1].mxu0 }
 0x202   :  { %v121_v41 = vpop.f32.mrb[2].mxu0 }
 0x203   :  { %130 = vst.msk [vmem:[%s278_s4] sm:$0xff] %vm129_vm4, %v127_v38  ;;  %v128_v42 = vmul.f32 %v191_v40, %v121_v41  ;;  %v178_v43 = vpop.f32.mrb[3].mxu0 }
 0x205   :  { %131 = vst.msk [vmem:[%s278_s4 + $0x8] sm:$0xff] %vm129_vm4, %v128_v42 }
 0x20a   :  { %v132_v44 = vld [vmem:[%s278_s4] sm:$0xff] }
 0x20b   :  { %v134_v45 = vsel %vm129_vm4, %v132_v44, -inf }
 0x20c   :  { %135 = vmax.xlane.f32.xlu1 %v134_v45  ;;  %v133_v46 = vld [vmem:[%s278_s4 + $0x8] sm:$0xff] }
 0x20d   :  { %v137_v47 = vsel %vm129_vm4, %v133_v46, -inf }
 0x210   :  { %138 = vmax.xlane.f32.xlu1 %v137_v47 }
 0x299   :  { %v136_v48 = vpop.xlane.xlu1 %135 }
 0x29a   :  { %v140_v49 = vsub.f32 %v132_v44, %v136_v48 }
 0x29c   :  { %v142_v50 = vmul.f32 1.442695, %v140_v49 }
 0x29d   :  { %v139_v51 = vpop.xlane.xlu1 %138 }
 0x29e   :  { %192 = vpow2.f32 %v142_v50  ;;  %v141_v52 = vsub.f32 %v133_v46, %v139_v51 }
 0x2a0   :  { %v144_v53 = vmul.f32 1.442695, %v141_v52 }
 0x2a2   :  { %194 = vpow2.f32 %v144_v53 }
 0x2a8   :  { %v193_v54 = vpop.eup %192 }
 0x2a9   :  { %v146_v55 = vsel %vm129_vm4, %v193_v54, 0.0 }
 0x2aa   :  { %147 = vadd.xlane.f32.xlu1 %v146_v55 }
 0x2ac   :  { %v195_v56 = vpop.eup %194 }
 0x2ad   :  { %v149_v57 = vsel %vm129_vm4, %v195_v56, 0.0 }
 0x2ae   :  { %150 = vadd.xlane.f32.xlu1 %v149_v57 }
 0x337   :  { %v148_v58 = vpop.xlane.xlu1 %147 }
 0x338   :  { %196 = vlog2.f32 %v148_v58 }
 0x33b   :  { %v151_v59 = vpop.xlane.xlu1 %150 }
 0x33c   :  { %198 = vlog2.f32 %v151_v59 }
 0x342   :  { %v197_v60 = vpop.eup %196 }
 0x343   :  { %v153_v61 = vmul.f32 0.6931472, %v197_v60 }
 0x345   :  { %v156_v62 = vsub.f32 %v140_v49, %v153_v61 }
 0x346   :  { %v199_v63 = vpop.eup %198 }
 0x347   :  { %158 = vst.msk [vmem:[%s278_s4] sm:$0xff] %vm129_vm4, %v156_v62  ;;  %v155_v0 = vmul.f32 0.6931472, %v199_v63 }
 0x349   :  { %v157_v1 = vsub.f32 %v141_v52, %v155_v0 }
 0x34b   :  { %159 = vst.msk [vmem:[%s278_s4 + $0x8] sm:$0xff] %vm129_vm4, %v157_v1 }

// kernel: net_forward.10
= control target key start
LH: loop header
LB: loop body
LE: loop exit
PB: predicated region body
PF: predicated region fallthrough
CT: control target
= control target key end

     0   :  { %v249_v0 = vmov 0.0   ;;  %vm250_vm0 = vmmov 0   ;;  %vm92_vm1 = vcmask 1043456   ;;  %vm40_vm2 = vcmask 261120   ;;  %s322_s1 = inlined_call_operand.vmem [shape: bf16[32,8], index: 1, kind: input, shape index: {}]   ;;  %s323_s0 = inlined_call_operand.vmem [shape: f32[16,32], index: 0, kind: input, shape index: {}]   ;;  %s324_s2 = inlined_call_operand.vmem [shape: f32[8,1], index: 2, kind: input, shape index: {}]   ;;  %s325_s4 = inlined_call_operand.vmem [shape: bf16[16,8], index: 4, kind: output, shape index: {0}]   ;;  %s326_s3 = inlined_call_operand.vmem [shape: f32[1,8], index: 3, kind: input, shape index: {}]   ;;  %s327_s5 = inlined_call_operand.vmem [shape: f32[16,1], index: 5, kind: output, shape index: {1}]   ;;  %s328_s6 = inlined_call_operand.vmem [shape: f32[1,16], index: 6, kind: output, shape index: {2}]  }
   0x1   :  { %225 = vmatprep.subr.bf16.mxu0 %v249_v0  ;;  %v247_v1 = vld [vmem:[%s322_s1] sm:$0xff]   ;;  %229 = vmatprep.mubr.msk.bf16.mxu0 %vm250_vm0, %v249_v0  ;;  %v248_v2 = vld [vmem:[%s322_s1 + $0x8] sm:$0xff]   ;;  %vm194_vm3 = vcmask 60416   ;;  %vm88_vm4 = vcmask 64512   ;;  %vm137_vm5 = vcmask 7168   ;;  %vm185_vm6 = vcmask 122880  }
   0x2   :  { %233 = vmatprep.subr.bf16.mxu1 %v249_v0  ;;  %235 = vmatprep.mubr.msk.bf16.mxu1 %vm250_vm0, %v249_v0  ;;  %v21_v3 = vld [vmem:[%s323_s0] sm:$0xff]  ;;  %v22_v4 = vld [vmem:[%s323_s0 + $0x8] sm:$0xff] }
   0x3   :  { %226 = vmatpush3.bf16.msra.mxu0 %v247_v1  ;;  %v86_v5 = vld [vmem:[%s324_s2] sm:$0xff]  ;;  %v23_v7 = vpack.c.bf16 %v22_v4, %v21_v3 }
   0x4   :  { %227 = vmatprep.subr.bf16.mxu0 %v249_v0  ;;  %v87_v6 = vpack.c.bf16 %v86_v5, %v86_v5  ;;  %v140_v17 = vld [vmem:[%s326_s3] sm:$0x1] }
   0x5   :  { %v141_v18 = vpack.c.bf16 %v140_v17, %v140_v17 }
   0x6   :  { %v94_v8 = vsel %vm92_vm1, %v87_v6, 0 }
   0x7   :  { %228 = vmatpush3.bf16.msra.mxu0 %v248_v2  ;;  %234 = vmatpush3.bf16.msra.mxu1 %v94_v8 }
   0x8   :  { %239 = vmatprep.subr.bf16.mxu1 %v249_v0 }
   0xa   :  { %230 = vmatmul.mubr.msk.bf16.vlgmr.msra.gmra.mrb[0].mxu0 %vm40_vm2, %v23_v7 }
  0xdd   :  { %v78_v9 = vpop.f32.mrb[0].mxu0 }
  0xde   :  { %v216_v10 = vpack.c.bf16 %v78_v9, %v78_v9  ;;  %v231_v11 = vpop.f32.mrb[1].mxu0 }
  0xdf   :  { %v81_v12 = vpop.f32.mrb[2].mxu0 }
  0xe0   :  { %195 = vst.msk [vmem:[%s325_s4] sm:$0xf] %vm194_vm3, %v216_v10  ;;  %v85_v13 = vpack.c.bf16 %v81_v12, %v78_v9  ;;  %v217_v14 = vpack.c.bf16 %v81_v12, %v81_v12  ;;  %v232_v15 = vpop.f32.mrb[3].mxu0 }
  0xe2   :  { %196 = vst.msk [vmem:[%s325_s4 + $0x4] sm:$0xf] %vm194_vm3, %v217_v14  ;;  %236 = vmatmul.mubr.msk.bf16.vlgmr.msra.gmra.mrb[0].mxu1 %vm88_vm4, %v85_v13  ;;  %v90_v16 = vsel %vm88_vm4, %v85_v13, 0 }
  0xe3   :  { %240 = vmatpush3.bf16.xpose.msra.mxu1 %v90_v16  ;;  %241 = vmatprep.mubr.msk.bf16.mxu1 %vm250_vm0, %v249_v0 }
  0xea   :  { %242 = vmatmul.mubr.msk.bf16.vlgmr.msra.gmra.mrb[4].mxu1 %vm88_vm4, %v141_v18 }
 0x1b5   :  { %v130_v19 = vpop.f32.mrb[0].mxu1 }
 0x1b6   :  { %138 = vst.msk [vmem:[%s327_s5] sm:$0xff] %vm137_vm5, %v130_v19  ;;  %v237_v20 = vpop.f32.mrb[1].mxu1 }
 0x1b7   :  { %v133_v21 = vpop.f32.mrb[2].mxu1 }
 0x1b8   :  { %139 = vst.msk [vmem:[%s327_s5 + $0x8] sm:$0xff] %vm137_vm5, %v133_v21  ;;  %v238_v22 = vpop.f32.mrb[3].mxu1 }
 0x1bd   :  { %v179_v23 = vpop.f32.mrb[4].mxu1 }
 0x1be   :  { %186 = vst.msk [vmem:[%s328_s6] sm:$0x1] %vm185_vm6, %v179_v23  ;;  %v243_v24 = vpop.f32.mrb[5].mxu1 }
 0x1bf   :  { %v182_v25 = vpop.f32.mrb[6].mxu1 }
 0x1c0   :  { %v244_v26 = vpop.f32.mrb[7].mxu1 }

</bundles_post_ra>
